<compile_context>
chip_gen: v7x
topology: tpu7x:2x2x1
jax: 0.10.0
libtpu: 0.0.40
codegen_flags: <defaults>
</compile_context>

<pallas_src>
import functools

import jax
import jax.numpy as jnp
from jax import lax
from jax.experimental import pallas as pl
from jax.experimental.pallas import tpu as pltpu

EPS = 1e-5  # PyTorch nn.LayerNorm default eps


# --------------------------------------------------------------------------
# in-kernel helpers (traced inside the Pallas kernel, f32 math)
# --------------------------------------------------------------------------
def _layernorm(x, gamma, beta):
    mu = jnp.mean(x, axis=-1, keepdims=True)
    var = jnp.mean((x - mu) ** 2, axis=-1, keepdims=True)
    return (x - mu) * lax.rsqrt(var + EPS) * gamma + beta


def _gelu_tanh(x):
    # tanh-form GELU: tanh goes to the EUP slot instead of a long VALU
    # polynomial; max abs deviation from PyTorch's exact erf nn.GELU() < 1e-3.
    c = 0.7978845608028654  # sqrt(2/pi)
    return 0.5 * x * (1.0 + jnp.tanh(c * (x + 0.044715 * x * x * x)))


# --------------------------------------------------------------------------
# fused ViT forward kernel: one grid step = (batch tile, transformer layer)
# --------------------------------------------------------------------------
def vit_fused_kernel(tok_ref,
                     ln1g_ref, ln1b_ref, wqkv_ref, wo_ref,
                     ln2g_ref, ln2b_ref, w1_ref, fb1_ref, w2_ref, fb2_ref,
                     hg_ref, hb_ref, wh_ref, bh_ref,
                     out_ref, x_sc,
                     *, bt, n_tok, heads, dim_head):
    l = pl.program_id(1)
    rows = bt * n_tok
    inner = heads * dim_head
    bf16 = jnp.bfloat16

    # ---- first layer step of each batch tile: load embedded tokens --------
    @pl.when(l == 0)
    def _init():
        x_sc[...] = tok_ref[0]                                       # (R, D) f32

    # ---- transformer layer l: pre-LN MHSA + residual, pre-LN MLP + residual
    x = x_sc[...]                                                    # (R, D) f32 residual
    xn = _layernorm(x, ln1g_ref[0], ln1b_ref[0]).astype(bf16)
    qkv = jnp.dot(xn, wqkv_ref[0], preferred_element_type=jnp.float32)  # (R, 3*inner)

    q3 = qkv[:, :inner].reshape(bt, n_tok, inner)                    # Wq pre-scaled
    k3 = qkv[:, inner:2 * inner].reshape(bt, n_tok, inner)
    v3 = qkv[:, 2 * inner:].reshape(bt, n_tok, inner)

    def to_heads(t):
        # (bt, N, inner) -> (heads*bt, N, dh): major-axis concat of lane slices
        # (no lane-dim reshape), so all heads go through ONE batched einsum.
        return jnp.concatenate(
            [t[:, :, h * dim_head:(h + 1) * dim_head] for h in range(heads)],
            axis=0).astype(bf16)

    qh, kh, vh = to_heads(q3), to_heads(k3), to_heads(v3)
    dots = jnp.einsum('bqd,bkd->bqk', qh, kh,
                      preferred_element_type=jnp.float32)            # (heads*bt, N, N)
    m = jnp.max(dots, axis=-1, keepdims=True)
    e = jnp.exp(dots - m)
    p = e * pl.reciprocal(jnp.sum(e, axis=-1, keepdims=True), approx=True)
    o = jnp.einsum('bqk,bkd->bqd', p.astype(bf16), vh,
                   preferred_element_type=jnp.float32)               # (heads*bt, N, dh)
    o = o.reshape(heads, bt, n_tok, dim_head)
    att = jnp.concatenate([o[h] for h in range(heads)], axis=-1)     # (bt, N, inner)
    att = att.reshape(rows, inner).astype(bf16)                      # lane-dense, no scratch
    x = x + jnp.dot(att, wo_ref[0], preferred_element_type=jnp.float32)

    xn2 = _layernorm(x, ln2g_ref[0], ln2b_ref[0]).astype(bf16)
    h1 = jnp.dot(xn2, w1_ref[0], preferred_element_type=jnp.float32) + fb1_ref[0]
    h1 = _gelu_tanh(h1).astype(bf16)
    x = x + (jnp.dot(h1, w2_ref[0], preferred_element_type=jnp.float32) + fb2_ref[0])
    x_sc[...] = x

    # ---- last layer step: final LN + classifier on token 0 of each image ---
    @pl.when(l == pl.num_programs(1) - 1)
    def _head():
        x0 = x_sc[pl.ds(0, bt, stride=n_tok), :]      # token 0, one strided read
        x0n = _layernorm(x0, hg_ref[...], hb_ref[...]).astype(bf16)
        logits = jnp.dot(x0n, wh_ref[...], preferred_element_type=jnp.float32)
        out_ref[0] = (logits + bh_ref[...]).astype(out_ref.dtype)


# --------------------------------------------------------------------------
# tiling / budgeting heuristics
# --------------------------------------------------------------------------
def _pick_batch_tile(batch, n_tok, *, target_rows=512, min_split_rows=256,
                     max_rows=4096):
    """Rows per grid step R = bt * n_tok.

    Per-layer weights are re-streamed every step, so arithmetic intensity is
    ~R flops per streamed weight byte; R >= ~512 keeps v5e/v6e/v7x
    compute-bound.  Never shrink a small batch (R < target) below the whole
    batch; only keep >=2 grid tiles (for dual-TC v7x) if each tile retains at
    least min_split_rows rows.
    """
    divisors = [d for d in range(1, batch + 1) if batch % d == 0]
    bt = next((d for d in divisors if d * n_tok >= target_rows), batch)
    # Prefer >=2 parallel tiles (v7x megacore) when it keeps tiles big enough.
    if bt == batch and batch > 1:
        proper = [d for d in divisors if d < batch and d * n_tok >= min_split_rows]
        if proper:
            bt = proper[-1]
    # VMEM safety cap for very large batches / long sequences.
    if bt * n_tok > max_rows:
        fits = [d for d in divisors if d * n_tok <= max_rows]
        bt = fits[-1] if fits else 1
    return max(bt, 1)


def _vmem_limit_bytes(R, D, H, inner, heads, n_tok, bt, C):
    layer_w = 2 * (3 * D * inner + inner * D + 2 * D * H)       # bf16 layer weights
    layer_b = 4 * (5 * D + H)                                   # f32 LN / biases
    stream = 2 * (layer_w + layer_b)                            # double-buffered stream
    tok_in = 2 * 4 * R * D                                      # token block (2 bufs)
    resid = 4 * R * D                                           # residual scratch
    interm = 4 * (3 * R * inner + R * H + bt * heads * n_tok * n_tok
                  + 2 * R * inner + R * D)                      # live f32 intermediates
    head = 2 * D * C + 4 * (2 * D + C) + 2 * 4 * bt * C
    need = stream + tok_in + resid + interm + head
    cap = 64 * 1024 * 1024                                      # conservative default
    try:
        cap = pltpu.get_tpu_info().vmem_capacity_bytes
    except Exception:
        pass
    return int(min(0.9 * cap, max(1.5 * need, 32 * 1024 * 1024)))


def _cost_estimate(B, n_tok, D, inner, H, C, depth, heads, nb):
    tokens = B * n_tok
    flops = depth * (2 * tokens * D * 3 * inner                 # fused QKV
                     + 4 * tokens * n_tok * inner               # dots + PV
                     + 2 * tokens * inner * D                   # out projection
                     + 4 * tokens * D * H)                      # MLP
    flops += 2 * B * D * C                                      # head
    trans = depth * (B * heads * n_tok * n_tok + tokens * H + 2 * tokens) + B
    layer_w_bytes = 2 * (3 * D * inner + inner * D + 2 * D * H) + 4 * (5 * D + H)
    bytes_acc = (tokens * D * 4 + B * C * 4
                 + nb * depth * layer_w_bytes                   # re-streamed per tile
                 + 2 * D * C + 4 * (2 * D + C))
    return pl.CostEstimate(flops=int(flops), transcendentals=int(trans),
                           bytes_accessed=int(bytes_acc))


# --------------------------------------------------------------------------
# pallas_call wrapper
# --------------------------------------------------------------------------
def vit_forward(img, params, *, patch, heads, dim_head):
    x = extract_patches(img, patch, patch)               # (B, h, w, patch_dim)
    B, hg_, wg_, P = x.shape
    n_tok = hg_ * wg_
    D = params["wp"].shape[1]
    depth = params["wqkv"].shape[0]
    inner = heads * dim_head
    H = params["w1"].shape[2]
    C = params["wh"].shape[1]

    # Patch embedding + bias + sincos pos-emb as a plain XLA GEMM in the
    # wrapper: the kernel then only keeps the (R, D) token block resident.
    pe = posemb_sincos_2d(hg_, wg_, D)
    tok = x.reshape(B, n_tok, P) @ params["wp"] + params["bp"] + pe   # (B, N, D) f32

    bt = _pick_batch_tile(B, n_tok)
    nb = B // bt
    R = bt * n_tok
    tok = tok.reshape(nb, R, D).astype(jnp.float32)

    kernel = functools.partial(vit_fused_kernel, bt=bt, n_tok=n_tok,
                               heads=heads, dim_head=dim_head)

    out = pl.pallas_call(
        kernel,
        out_shape=jax.ShapeDtypeStruct((nb, bt, C), jnp.float32),
        grid=(nb, depth),
        in_specs=[
            pl.BlockSpec((1, R, D), lambda b, l: (b, 0, 0)),            # embedded tokens
            pl.BlockSpec((1, 1, D), lambda b, l: (l, 0, 0)),            # attn LN gamma
            pl.BlockSpec((1, 1, D), lambda b, l: (l, 0, 0)),            # attn LN beta
            pl.BlockSpec((1, D, 3 * inner), lambda b, l: (l, 0, 0)),    # fused Wqkv (bf16)
            pl.BlockSpec((1, inner, D), lambda b, l: (l, 0, 0)),        # Wo (bf16)
            pl.BlockSpec((1, 1, D), lambda b, l: (l, 0, 0)),            # ff LN gamma
            pl.BlockSpec((1, 1, D), lambda b, l: (l, 0, 0)),            # ff LN beta
            pl.BlockSpec((1, D, H), lambda b, l: (l, 0, 0)),            # W1 (bf16)
            pl.BlockSpec((1, 1, H), lambda b, l: (l, 0, 0)),            # b1
            pl.BlockSpec((1, H, D), lambda b, l: (l, 0, 0)),            # W2 (bf16)
            pl.BlockSpec((1, 1, D), lambda b, l: (l, 0, 0)),            # b2
            pl.BlockSpec((1, D), lambda b, l: (0, 0)),                  # head LN gamma
            pl.BlockSpec((1, D), lambda b, l: (0, 0)),                  # head LN beta
            pl.BlockSpec((D, C), lambda b, l: (0, 0)),                  # Wh (bf16)
            pl.BlockSpec((1, C), lambda b, l: (0, 0)),                  # bh
        ],
        out_specs=pl.BlockSpec((1, bt, C), lambda b, l: (b, 0, 0)),
        scratch_shapes=[pltpu.VMEM((R, D), jnp.float32)],               # residual stream
        compiler_params=pltpu.CompilerParams(
            dimension_semantics=("parallel", "arbitrary"),
            vmem_limit_bytes=_vmem_limit_bytes(R, D, H, inner, heads, n_tok, bt, C)),
        cost_estimate=_cost_estimate(B, n_tok, D, inner, H, C, depth, heads, nb),
    )(tok,
      params["ln1_g"], params["ln1_b"], params["wqkv"], params["wo"],
      params["ln2_g"], params["ln2_b"], params["w1"], params["ff_b1"],
      params["w2"], params["ff_b2"],
      params["hg"], params["hb"], params["wh"], params["bh"])
    return out.reshape(B, C)


# --------------------------------------------------------------------------
# plain-JAX glue (patchify, sincos pos-emb, parameter init)
# --------------------------------------------------------------------------
def extract_patches(img, p1, p2):
    # 'b c (h p1) (w p2) -> b h w (p1 p2 c)'
    B, C, Hh, Ww = img.shape
    h, w = Hh // p1, Ww // p2
    x = img.reshape(B, C, h, p1, w, p2)
    x = x.transpose(0, 2, 4, 3, 5, 1)             # b h w p1 p2 c
    return x.reshape(B, h, w, p1 * p2 * C)


def posemb_sincos_2d(h, w, dim, temperature=10000.0, dtype=jnp.float32):
    assert dim % 4 == 0, "feature dimension must be multiple of 4"
    y, x = jnp.meshgrid(jnp.arange(h, dtype=jnp.float32),
                        jnp.arange(w, dtype=jnp.float32), indexing="ij")
    omega = jnp.arange(dim // 4, dtype=jnp.float32) / (dim // 4 - 1)
    omega = 1.0 / (temperature ** omega)
    y = y.flatten()[:, None] * omega[None, :]
    x = x.flatten()[:, None] * omega[None, :]
    pe = jnp.concatenate([jnp.sin(x), jnp.cos(x), jnp.sin(y), jnp.cos(y)], axis=1)
    return pe.astype(dtype)


def init_params(key, *, channels, patch, dim, depth, heads, dim_head, mlp_dim,
                num_classes):
    patch_dim = channels * patch * patch
    inner = heads * dim_head
    scale = dim_head ** -0.5
    std = 0.02
    ks = jax.random.split(key, 2 + 6 * depth)

    def rnd(i, shape):
        return jax.random.normal(ks[i], shape, jnp.float32) * std

    wqkv_l, wo_l, w1_l, w2_l = [], [], [], []
    ki = 2
    for _ in range(depth):
        wq = rnd(ki + 0, (dim, inner)) * scale        # fold 1/sqrt(dh) into to_q
        wk = rnd(ki + 1, (dim, inner))
        wv = rnd(ki + 2, (dim, inner))
        wqkv_l.append(jnp.concatenate([wq, wk, wv], axis=1))
        wo_l.append(rnd(ki + 3, (inner, dim)))
        w1_l.append(rnd(ki + 4, (dim, mlp_dim)))
        w2_l.append(rnd(ki + 5, (mlp_dim, dim)))
        ki += 6

    return {
        # Patch-embed weight stays f32 (used by the wrapper XLA GEMM); weights
        # feeding the in-kernel MXU are stored bf16; biases / LN params are f32.
        "wp": rnd(0, (patch_dim, dim)),
        "bp": jnp.zeros((1, dim), jnp.float32),
        "ln1_g": jnp.ones((depth, 1, dim), jnp.float32),
        "ln1_b": jnp.zeros((depth, 1, dim), jnp.float32),
        "wqkv": jnp.stack(wqkv_l).astype(jnp.bfloat16),
        "wo": jnp.stack(wo_l).astype(jnp.bfloat16),
        "ln2_g": jnp.ones((depth, 1, dim), jnp.float32),
        "ln2_b": jnp.zeros((depth, 1, dim), jnp.float32),
        "w1": jnp.stack(w1_l).astype(jnp.bfloat16),
        "ff_b1": jnp.zeros((depth, 1, mlp_dim), jnp.float32),
        "w2": jnp.stack(w2_l).astype(jnp.bfloat16),
        "ff_b2": jnp.zeros((depth, 1, dim), jnp.float32),
        "hg": jnp.ones((1, dim), jnp.float32),
        "hb": jnp.zeros((1, dim), jnp.float32),
        "wh": rnd(1, (dim, num_classes)).astype(jnp.bfloat16),
        "bh": jnp.zeros((1, num_classes), jnp.float32),
    }


if __name__ == "__main__":
    # Small config consistent with the module's forward.
    B, C, IMG, PATCH = 2, 3, 32, 8
    DIM, DEPTH, HEADS, DIM_HEAD, MLP_DIM, NUM_CLASSES = 64, 2, 4, 16, 128, 10

    key = jax.random.PRNGKey(0)
    kimg, kparam = jax.random.split(key)
    img = jax.random.normal(kimg, (B, C, IMG, IMG), jnp.float32)
    params = init_params(kparam, channels=C, patch=PATCH, dim=DIM, depth=DEPTH,
                         heads=HEADS, dim_head=DIM_HEAD, mlp_dim=MLP_DIM,
                         num_classes=NUM_CLASSES)

    fwd = jax.jit(functools.partial(vit_forward, patch=PATCH, heads=HEADS,
                                    dim_head=DIM_HEAD))
    out = jax.block_until_ready(fwd(img, params))
    assert out.shape == (B, NUM_CLASSES) and out.dtype == jnp.float32
    print("KERNEL_OK")
</pallas_src>

<mosaic_0001>
module attributes {stable_mosaic.version = 11 : i64} {
  func.func @vit_fused_kernel(%arg0: i32, %arg1: i32, %arg2: memref<1x32x64xf32, #tpu.memory_space<vmem>>, %arg3: memref<1x1x64xf32, #tpu.memory_space<vmem>>, %arg4: memref<1x1x64xf32, #tpu.memory_space<vmem>>, %arg5: memref<1x64x192xbf16, #tpu.memory_space<vmem>>, %arg6: memref<1x64x64xbf16, #tpu.memory_space<vmem>>, %arg7: memref<1x1x64xf32, #tpu.memory_space<vmem>>, %arg8: memref<1x1x64xf32, #tpu.memory_space<vmem>>, %arg9: memref<1x64x128xbf16, #tpu.memory_space<vmem>>, %arg10: memref<1x1x128xf32, #tpu.memory_space<vmem>>, %arg11: memref<1x128x64xbf16, #tpu.memory_space<vmem>>, %arg12: memref<1x1x64xf32, #tpu.memory_space<vmem>>, %arg13: memref<1x64xf32, #tpu.memory_space<vmem>>, %arg14: memref<1x64xf32, #tpu.memory_space<vmem>>, %arg15: memref<64x10xbf16, #tpu.memory_space<vmem>>, %arg16: memref<1x10xf32, #tpu.memory_space<vmem>>, %arg17: memref<1x2x10xf32, #tpu.memory_space<vmem>>, %arg18: memref<32x64xf32, #tpu.memory_space<vmem>>) attributes {dimension_semantics = [#tpu.dimension_semantics<parallel>, #tpu.dimension_semantics<arbitrary>], iteration_bounds = array<i64: 1, 2>, scalar_prefetch = 0 : i64, scratch_operands = 1 : i64, tpu.core_type = #tpu.core_type<tc>, window_params = [{transform_indices = @transform_0, window_bounds = array<i64: 1, 32, 64>}, {transform_indices = @transform_1, window_bounds = array<i64: 1, 1, 64>}, {transform_indices = @transform_2, window_bounds = array<i64: 1, 1, 64>}, {transform_indices = @transform_3, window_bounds = array<i64: 1, 64, 192>}, {transform_indices = @transform_4, window_bounds = array<i64: 1, 64, 64>}, {transform_indices = @transform_5, window_bounds = array<i64: 1, 1, 64>}, {transform_indices = @transform_6, window_bounds = array<i64: 1, 1, 64>}, {transform_indices = @transform_7, window_bounds = array<i64: 1, 64, 128>}, {transform_indices = @transform_8, window_bounds = array<i64: 1, 1, 128>}, {transform_indices = @transform_9, window_bounds = array<i64: 1, 128, 64>}, {transform_indices = @transform_10, window_bounds = array<i64: 1, 1, 64>}, {pipeline_mode = #tpu.pipeline_mode<synchronous>, transform_indices = @transform_11, window_bounds = array<i64: 1, 64>}, {pipeline_mode = #tpu.pipeline_mode<synchronous>, transform_indices = @transform_12, window_bounds = array<i64: 1, 64>}, {pipeline_mode = #tpu.pipeline_mode<synchronous>, transform_indices = @transform_13, window_bounds = array<i64: 64, 10>}, {pipeline_mode = #tpu.pipeline_mode<synchronous>, transform_indices = @transform_14, window_bounds = array<i64: 1, 10>}, {transform_indices = @transform_15, window_bounds = array<i64: 1, 2, 10>}]} {
    %c0_i32 = arith.constant 0 : i32
    %0 = arith.cmpi eq, %arg1, %c0_i32 : i32
    %1 = arith.extui %0 : i1 to i32
    %c0_i32_0 = arith.constant 0 : i32
    %2 = arith.cmpi ne, %1, %c0_i32_0 : i32
    scf.if %2 {
      %c0_56 = arith.constant 0 : index
      %c0_57 = arith.constant 0 : index
      %c0_58 = arith.constant 0 : index
      %147 = vector.load %arg2[%c0_56, %c0_57, %c0_58] : memref<1x32x64xf32, #tpu.memory_space<vmem>>, vector<1x32x64xf32>
      %148 = vector.shape_cast %147 : vector<1x32x64xf32> to vector<32x64xf32>
      %c0_59 = arith.constant 0 : index
      %c0_60 = arith.constant 0 : index
      %149 = vector.load %arg18[%c0_59, %c0_60] : memref<32x64xf32, #tpu.memory_space<vmem>>, vector<32x64xf32>
      tpu.vector_store %arg18[%c0_59, %c0_60], %148 {strides = array<i32>} : memref<32x64xf32, #tpu.memory_space<vmem>>, vector<32x64xf32>,
    } else {
    }
    %c0 = arith.constant 0 : index
    %c0_1 = arith.constant 0 : index
    %3 = vector.load %arg18[%c0, %c0_1] : memref<32x64xf32, #tpu.memory_space<vmem>>, vector<32x64xf32>
    %c0_2 = arith.constant 0 : index
    %c0_3 = arith.constant 0 : index
    %c0_4 = arith.constant 0 : index
    %4 = vector.load %arg3[%c0_2, %c0_3, %c0_4] : memref<1x1x64xf32, #tpu.memory_space<vmem>>, vector<1x1x64xf32>
    %5 = vector.shape_cast %4 : vector<1x1x64xf32> to vector<1x64xf32>
    %c0_5 = arith.constant 0 : index
    %c0_6 = arith.constant 0 : index
    %c0_7 = arith.constant 0 : index
    %6 = vector.load %arg4[%c0_5, %c0_6, %c0_7] : memref<1x1x64xf32, #tpu.memory_space<vmem>>, vector<1x1x64xf32>
    %7 = vector.shape_cast %6 : vector<1x1x64xf32> to vector<1x64xf32>
    %cst = arith.constant dense<0.000000e+00> : vector<32xf32>
    %8 = vector.multi_reduction <add>, %3, %cst [1] : vector<32x64xf32> to vector<32xf32>
    %9 = vector.shape_cast %8 : vector<32xf32> to vector<32x1xf32>
    %cst_8 = arith.constant 6.400000e+01 : f32
    %10 = vector.broadcast %cst_8 : f32 to vector<32x1xf32>
    %11 = arith.divf %9, %10 : vector<32x1xf32>
    %12 = vector.broadcast %11 : vector<32x1xf32> to vector<32x64xf32>
    %13 = arith.subf %3, %12 : vector<32x64xf32>
    %14 = arith.mulf %13, %13 : vector<32x64xf32>
    %cst_9 = arith.constant dense<0.000000e+00> : vector<32xf32>
    %15 = vector.multi_reduction <add>, %14, %cst_9 [1] : vector<32x64xf32> to vector<32xf32>
    %16 = vector.shape_cast %15 : vector<32xf32> to vector<32x1xf32>
    %cst_10 = arith.constant 6.400000e+01 : f32
    %17 = vector.broadcast %cst_10 : f32 to vector<32x1xf32>
    %18 = arith.divf %16, %17 : vector<32x1xf32>
    %19 = vector.broadcast %11 : vector<32x1xf32> to vector<32x64xf32>
    %20 = arith.subf %3, %19 : vector<32x64xf32>
    %cst_11 = arith.constant 9.99999974E-6 : f32
    %21 = vector.broadcast %cst_11 : f32 to vector<32x1xf32>
    %22 = arith.addf %18, %21 : vector<32x1xf32>
    %23 = math.rsqrt %22 : vector<32x1xf32>
    %24 = vector.broadcast %23 : vector<32x1xf32> to vector<32x64xf32>
    %25 = arith.mulf %20, %24 : vector<32x64xf32>
    %26 = vector.broadcast %5 : vector<1x64xf32> to vector<32x64xf32>
    %27 = arith.mulf %25, %26 : vector<32x64xf32>
    %28 = vector.broadcast %7 : vector<1x64xf32> to vector<32x64xf32>
    %29 = arith.addf %27, %28 : vector<32x64xf32>
    %30 = arith.truncf %29 : vector<32x64xf32> to vector<32x64xbf16>
    %c0_12 = arith.constant 0 : index
    %c0_13 = arith.constant 0 : index
    %c0_14 = arith.constant 0 : index
    %31 = vector.load %arg5[%c0_12, %c0_13, %c0_14] : memref<1x64x192xbf16, #tpu.memory_space<vmem>>, vector<1x64x192xbf16>
    %32 = vector.shape_cast %31 : vector<1x64x192xbf16> to vector<64x192xbf16>
    %cst_15 = arith.constant dense<0.000000e+00> : vector<32x192xf32>
    %33 = tpu.matmul %30, %32, %cst_15 {dimension_numbers = #tpu.dot_dimension_numbers<[1], [0], [0], [1], [0, 0, 1, 1], [], []>} : vector<32x64xbf16>, vector<64x192xbf16>, vector<32x192xf32> -> vector<32x192xf32>
    %34 = vector.extract_strided_slice %33 {offsets = [0, 0], sizes = [32, 64], strides = [1, 1]} : vector<32x192xf32> to vector<32x64xf32>
    %35 = vector.shape_cast %34 : vector<32x64xf32> to vector<2x16x64xf32>
    %36 = vector.extract_strided_slice %33 {offsets = [0, 64], sizes = [32, 64], strides = [1, 1]} : vector<32x192xf32> to vector<32x64xf32>
    %37 = vector.shape_cast %36 : vector<32x64xf32> to vector<2x16x64xf32>
    %38 = vector.extract_strided_slice %33 {offsets = [0, 128], sizes = [32, 64], strides = [1, 1]} : vector<32x192xf32> to vector<32x64xf32>
    %39 = vector.shape_cast %38 : vector<32x64xf32> to vector<2x16x64xf32>
    %40 = vector.extract_strided_slice %35 {offsets = [0, 0, 0], sizes = [2, 16, 16], strides = [1, 1, 1]} : vector<2x16x64xf32> to vector<2x16x16xf32>
    %41 = vector.extract_strided_slice %35 {offsets = [0, 0, 16], sizes = [2, 16, 16], strides = [1, 1, 1]} : vector<2x16x64xf32> to vector<2x16x16xf32>
    %42 = vector.extract_strided_slice %35 {offsets = [0, 0, 32], sizes = [2, 16, 16], strides = [1, 1, 1]} : vector<2x16x64xf32> to vector<2x16x16xf32>
    %43 = vector.extract_strided_slice %35 {offsets = [0, 0, 48], sizes = [2, 16, 16], strides = [1, 1, 1]} : vector<2x16x64xf32> to vector<2x16x16xf32>
    %44 = tpu.concatenate %40, %41, %42, %43 in 0 : vector<2x16x16xf32>, vector<2x16x16xf32>, vector<2x16x16xf32>, vector<2x16x16xf32> -> vector<8x16x16xf32>
    %45 = arith.truncf %44 : vector<8x16x16xf32> to vector<8x16x16xbf16>
    %46 = vector.extract_strided_slice %37 {offsets = [0, 0, 0], sizes = [2, 16, 16], strides = [1, 1, 1]} : vector<2x16x64xf32> to vector<2x16x16xf32>
    %47 = vector.extract_strided_slice %37 {offsets = [0, 0, 16], sizes = [2, 16, 16], strides = [1, 1, 1]} : vector<2x16x64xf32> to vector<2x16x16xf32>
    %48 = vector.extract_strided_slice %37 {offsets = [0, 0, 32], sizes = [2, 16, 16], strides = [1, 1, 1]} : vector<2x16x64xf32> to vector<2x16x16xf32>
    %49 = vector.extract_strided_slice %37 {offsets = [0, 0, 48], sizes = [2, 16, 16], strides = [1, 1, 1]} : vector<2x16x64xf32> to vector<2x16x16xf32>
    %50 = tpu.concatenate %46, %47, %48, %49 in 0 : vector<2x16x16xf32>, vector<2x16x16xf32>, vector<2x16x16xf32>, vector<2x16x16xf32> -> vector<8x16x16xf32>
    %51 = arith.truncf %50 : vector<8x16x16xf32> to vector<8x16x16xbf16>
    %52 = vector.extract_strided_slice %39 {offsets = [0, 0, 0], sizes = [2, 16, 16], strides = [1, 1, 1]} : vector<2x16x64xf32> to vector<2x16x16xf32>
    %53 = vector.extract_strided_slice %39 {offsets = [0, 0, 16], sizes = [2, 16, 16], strides = [1, 1, 1]} : vector<2x16x64xf32> to vector<2x16x16xf32>
    %54 = vector.extract_strided_slice %39 {offsets = [0, 0, 32], sizes = [2, 16, 16], strides = [1, 1, 1]} : vector<2x16x64xf32> to vector<2x16x16xf32>
    %55 = vector.extract_strided_slice %39 {offsets = [0, 0, 48], sizes = [2, 16, 16], strides = [1, 1, 1]} : vector<2x16x64xf32> to vector<2x16x16xf32>
    %56 = tpu.concatenate %52, %53, %54, %55 in 0 : vector<2x16x16xf32>, vector<2x16x16xf32>, vector<2x16x16xf32>, vector<2x16x16xf32> -> vector<8x16x16xf32>
    %57 = arith.truncf %56 : vector<8x16x16xf32> to vector<8x16x16xbf16>
    "tpu.trace_start"() <{level = 10 : i32, message = "bqd,bkd->bqk"}> : () -> ()
    %cst_16 = arith.constant dense<0.000000e+00> : vector<8x16x16xf32>
    %58 = tpu.matmul %45, %51, %cst_16 {dimension_numbers = #tpu.dot_dimension_numbers<[2], [2], [1], [1], [0, 0, 0, 1, 1, 1], [0], [0]>} : vector<8x16x16xbf16>, vector<8x16x16xbf16>, vector<8x16x16xf32> -> vector<8x16x16xf32>
    "tpu.trace_stop"() : () -> ()
    %cst_17 = arith.constant dense<0xFF800000> : vector<8x16xf32>
    %59 = vector.multi_reduction <maximumf>, %58, %cst_17 [2] : vector<8x16x16xf32> to vector<8x16xf32>
    %60 = vector.shape_cast %59 : vector<8x16xf32> to vector<8x16x1xf32>
    %61 = vector.broadcast %60 : vector<8x16x1xf32> to vector<8x16x16xf32>
    %62 = arith.subf %58, %61 : vector<8x16x16xf32>
    %63 = math.exp %62 : vector<8x16x16xf32>
    %cst_18 = arith.constant dense<0.000000e+00> : vector<8x16xf32>
    %64 = vector.multi_reduction <add>, %63, %cst_18 [2] : vector<8x16x16xf32> to vector<8x16xf32>
    %65 = vector.shape_cast %64 : vector<8x16xf32> to vector<8x16x1xf32>
    %66 = tpu.reciprocal %65 {approx = true} : vector<8x16x1xf32> -> vector<8x16x1xf32>
    %67 = vector.broadcast %66 : vector<8x16x1xf32> to vector<8x16x16xf32>
    %68 = arith.mulf %63, %67 : vector<8x16x16xf32>
    %69 = arith.truncf %68 : vector<8x16x16xf32> to vector<8x16x16xbf16>
    "tpu.trace_start"() <{level = 10 : i32, message = "bqk,bkd->bqd"}> : () -> ()
    %cst_19 = arith.constant dense<0.000000e+00> : vector<8x16x16xf32>
    %70 = tpu.matmul %69, %57, %cst_19 {dimension_numbers = #tpu.dot_dimension_numbers<[2], [1], [1], [2], [0, 0, 0, 1, 1, 2], [0], [0]>} : vector<8x16x16xbf16>, vector<8x16x16xbf16>, vector<8x16x16xf32> -> vector<8x16x16xf32>
    "tpu.trace_stop"() : () -> ()
    %71 = vector.shape_cast %70 : vector<8x16x16xf32> to vector<4x2x16x16xf32>
    %72 = vector.extract_strided_slice %71 {offsets = [0, 0, 0, 0], sizes = [1, 2, 16, 16], strides = [1, 1, 1, 1]} : vector<4x2x16x16xf32> to vector<1x2x16x16xf32>
    %73 = vector.shape_cast %72 : vector<1x2x16x16xf32> to vector<2x16x16xf32>
    %74 = vector.extract_strided_slice %71 {offsets = [1, 0, 0, 0], sizes = [1, 2, 16, 16], strides = [1, 1, 1, 1]} : vector<4x2x16x16xf32> to vector<1x2x16x16xf32>
    %75 = vector.shape_cast %74 : vector<1x2x16x16xf32> to vector<2x16x16xf32>
    %76 = vector.extract_strided_slice %71 {offsets = [2, 0, 0, 0], sizes = [1, 2, 16, 16], strides = [1, 1, 1, 1]} : vector<4x2x16x16xf32> to vector<1x2x16x16xf32>
    %77 = vector.shape_cast %76 : vector<1x2x16x16xf32> to vector<2x16x16xf32>
    %78 = vector.extract_strided_slice %71 {offsets = [3, 0, 0, 0], sizes = [1, 2, 16, 16], strides = [1, 1, 1, 1]} : vector<4x2x16x16xf32> to vector<1x2x16x16xf32>
    %79 = vector.shape_cast %78 : vector<1x2x16x16xf32> to vector<2x16x16xf32>
    %80 = tpu.concatenate %73, %75, %77, %79 in 2 : vector<2x16x16xf32>, vector<2x16x16xf32>, vector<2x16x16xf32>, vector<2x16x16xf32> -> vector<2x16x64xf32>
    %81 = vector.shape_cast %80 : vector<2x16x64xf32> to vector<32x64xf32>
    %82 = arith.truncf %81 : vector<32x64xf32> to vector<32x64xbf16>
    %c0_20 = arith.constant 0 : index
    %c0_21 = arith.constant 0 : index
    %c0_22 = arith.constant 0 : index
    %83 = vector.load %arg6[%c0_20, %c0_21, %c0_22] : memref<1x64x64xbf16, #tpu.memory_space<vmem>>, vector<1x64x64xbf16>
    %84 = vector.shape_cast %83 : vector<1x64x64xbf16> to vector<64x64xbf16>
    %cst_23 = arith.constant dense<0.000000e+00> : vector<32x64xf32>
    %85 = tpu.matmul %82, %84, %cst_23 {dimension_numbers = #tpu.dot_dimension_numbers<[1], [0], [0], [1], [0, 0, 1, 1], [], []>} : vector<32x64xbf16>, vector<64x64xbf16>, vector<32x64xf32> -> vector<32x64xf32>
    %86 = arith.addf %3, %85 : vector<32x64xf32>
    %c0_24 = arith.constant 0 : index
    %c0_25 = arith.constant 0 : index
    %c0_26 = arith.constant 0 : index
    %87 = vector.load %arg7[%c0_24, %c0_25, %c0_26] : memref<1x1x64xf32, #tpu.memory_space<vmem>>, vector<1x1x64xf32>
    %88 = vector.shape_cast %87 : vector<1x1x64xf32> to vector<1x64xf32>
    %c0_27 = arith.constant 0 : index
    %c0_28 = arith.constant 0 : index
    %c0_29 = arith.constant 0 : index
    %89 = vector.load %arg8[%c0_27, %c0_28, %c0_29] : memref<1x1x64xf32, #tpu.memory_space<vmem>>, vector<1x1x64xf32>
    %90 = vector.shape_cast %89 : vector<1x1x64xf32> to vector<1x64xf32>
    %cst_30 = arith.constant dense<0.000000e+00> : vector<32xf32>
    %91 = vector.multi_reduction <add>, %86, %cst_30 [1] : vector<32x64xf32> to vector<32xf32>
    %92 = vector.shape_cast %91 : vector<32xf32> to vector<32x1xf32>
    %cst_31 = arith.constant 6.400000e+01 : f32
    %93 = vector.broadcast %cst_31 : f32 to vector<32x1xf32>
    %94 = arith.divf %92, %93 : vector<32x1xf32>
    %95 = vector.broadcast %94 : vector<32x1xf32> to vector<32x64xf32>
    %96 = arith.subf %86, %95 : vector<32x64xf32>
    %97 = arith.mulf %96, %96 : vector<32x64xf32>
    %cst_32 = arith.constant dense<0.000000e+00> : vector<32xf32>
    %98 = vector.multi_reduction <add>, %97, %cst_32 [1] : vector<32x64xf32> to vector<32xf32>
    %99 = vector.shape_cast %98 : vector<32xf32> to vector<32x1xf32>
    %cst_33 = arith.constant 6.400000e+01 : f32
    %100 = vector.broadcast %cst_33 : f32 to vector<32x1xf32>
    %101 = arith.divf %99, %100 : vector<32x1xf32>
    %102 = vector.broadcast %94 : vector<32x1xf32> to vector<32x64xf32>
    %103 = arith.subf %86, %102 : vector<32x64xf32>
    %cst_34 = arith.constant 9.99999974E-6 : f32
    %104 = vector.broadcast %cst_34 : f32 to vector<32x1xf32>
    %105 = arith.addf %101, %104 : vector<32x1xf32>
    %106 = math.rsqrt %105 : vector<32x1xf32>
    %107 = vector.broadcast %106 : vector<32x1xf32> to vector<32x64xf32>
    %108 = arith.mulf %103, %107 : vector<32x64xf32>
    %109 = vector.broadcast %88 : vector<1x64xf32> to vector<32x64xf32>
    %110 = arith.mulf %108, %109 : vector<32x64xf32>
    %111 = vector.broadcast %90 : vector<1x64xf32> to vector<32x64xf32>
    %112 = arith.addf %110, %111 : vector<32x64xf32>
    %113 = arith.truncf %112 : vector<32x64xf32> to vector<32x64xbf16>
    %c0_35 = arith.constant 0 : index
    %c0_36 = arith.constant 0 : index
    %c0_37 = arith.constant 0 : index
    %114 = vector.load %arg9[%c0_35, %c0_36, %c0_37] : memref<1x64x128xbf16, #tpu.memory_space<vmem>>, vector<1x64x128xbf16>
    %115 = vector.shape_cast %114 : vector<1x64x128xbf16> to vector<64x128xbf16>
    %cst_38 = arith.constant dense<0.000000e+00> : vector<32x128xf32>
    %116 = tpu.matmul %113, %115, %cst_38 {dimension_numbers = #tpu.dot_dimension_numbers<[1], [0], [0], [1], [0, 0, 1, 1], [], []>} : vector<32x64xbf16>, vector<64x128xbf16>, vector<32x128xf32> -> vector<32x128xf32>
    %c0_39 = arith.constant 0 : index
    %c0_40 = arith.constant 0 : index
    %c0_41 = arith.constant 0 : index
    %117 = vector.load %arg10[%c0_39, %c0_40, %c0_41] : memref<1x1x128xf32, #tpu.memory_space<vmem>>, vector<1x1x128xf32>
    %118 = vector.shape_cast %117 : vector<1x1x128xf32> to vector<1x128xf32>
    %119 = vector.broadcast %118 : vector<1x128xf32> to vector<32x128xf32>
    %120 = arith.addf %116, %119 : vector<32x128xf32>
    %cst_42 = arith.constant 5.000000e-01 : f32
    %121 = vector.broadcast %cst_42 : f32 to vector<32x128xf32>
    %122 = arith.mulf %121, %120 : vector<32x128xf32>
    %cst_43 = arith.constant 4.471500e-02 : f32
    %123 = vector.broadcast %cst_43 : f32 to vector<32x128xf32>
    %124 = arith.mulf %123, %120 : vector<32x128xf32>
    %125 = arith.mulf %124, %120 : vector<32x128xf32>
    %126 = arith.mulf %125, %120 : vector<32x128xf32>
    %127 = arith.addf %120, %126 : vector<32x128xf32>
    %cst_44 = arith.constant 0.797884583 : f32
    %128 = vector.broadcast %cst_44 : f32 to vector<32x128xf32>
    %129 = arith.mulf %128, %127 : vector<32x128xf32>
    %130 = math.tanh %129 : vector<32x128xf32>
    %cst_45 = arith.constant 1.000000e+00 : f32
    %131 = vector.broadcast %cst_45 : f32 to vector<32x128xf32>
    %132 = arith.addf %131, %130 : vector<32x128xf32>
    %133 = arith.mulf %122, %132 : vector<32x128xf32>
    %134 = arith.truncf %133 : vector<32x128xf32> to vector<32x128xbf16>
    %c0_46 = arith.constant 0 : index
    %c0_47 = arith.constant 0 : index
    %c0_48 = arith.constant 0 : index
    %135 = vector.load %arg11[%c0_46, %c0_47, %c0_48] : memref<1x128x64xbf16, #tpu.memory_space<vmem>>, vector<1x128x64xbf16>
    %136 = vector.shape_cast %135 : vector<1x128x64xbf16> to vector<128x64xbf16>
    %cst_49 = arith.constant dense<0.000000e+00> : vector<32x64xf32>
    %137 = tpu.matmul %134, %136, %cst_49 {dimension_numbers = #tpu.dot_dimension_numbers<[1], [0], [0], [1], [0, 0, 1, 1], [], []>} : vector<32x128xbf16>, vector<128x64xbf16>, vector<32x64xf32> -> vector<32x64xf32>
    %c0_50 = arith.constant 0 : index
    %c0_51 = arith.constant 0 : index
    %c0_52 = arith.constant 0 : index
    %138 = vector.load %arg12[%c0_50, %c0_51, %c0_52] : memref<1x1x64xf32, #tpu.memory_space<vmem>>, vector<1x1x64xf32>
    %139 = vector.shape_cast %138 : vector<1x1x64xf32> to vector<1x64xf32>
    %140 = vector.broadcast %139 : vector<1x64xf32> to vector<32x64xf32>
    %141 = arith.addf %137, %140 : vector<32x64xf32>
    %142 = arith.addf %86, %141 : vector<32x64xf32>
    %c0_53 = arith.constant 0 : index
    %c0_54 = arith.constant 0 : index
    %143 = vector.load %arg18[%c0_53, %c0_54] : memref<32x64xf32, #tpu.memory_space<vmem>>, vector<32x64xf32>
    tpu.vector_store %arg18[%c0_53, %c0_54], %142 {strides = array<i32>} : memref<32x64xf32, #tpu.memory_space<vmem>>, vector<32x64xf32>,
    %c1_i32 = arith.constant 1 : i32
    %144 = arith.cmpi eq, %arg1, %c1_i32 : i32
    %145 = arith.extui %144 : i1 to i32
    %c0_i32_55 = arith.constant 0 : i32
    %146 = arith.cmpi ne, %145, %c0_i32_55 : i32
    scf.if %146 {
      %c0_56 = arith.constant 0 : index
      %c0_57 = arith.constant 0 : index
      %147 = tpu.strided_load %arg18[%c0_56, %c0_57] {strides = array<i32: 16, 1>} : memref<32x64xf32, #tpu.memory_space<vmem>>, vector<2x64xf32>
      %c0_58 = arith.constant 0 : index
      %c0_59 = arith.constant 0 : index
      %148 = vector.load %arg13[%c0_58, %c0_59] : memref<1x64xf32, #tpu.memory_space<vmem>>, vector<1x64xf32>
      %c0_60 = arith.constant 0 : index
      %c0_61 = arith.constant 0 : index
      %149 = vector.load %arg14[%c0_60, %c0_61] : memref<1x64xf32, #tpu.memory_space<vmem>>, vector<1x64xf32>
      %cst_62 = arith.constant dense<0.000000e+00> : vector<2xf32>
      %150 = vector.multi_reduction <add>, %147, %cst_62 [1] : vector<2x64xf32> to vector<2xf32>
      %151 = vector.shape_cast %150 : vector<2xf32> to vector<2x1xf32>
      %cst_63 = arith.constant 6.400000e+01 : f32
      %152 = vector.broadcast %cst_63 : f32 to vector<2x1xf32>
      %153 = arith.divf %151, %152 : vector<2x1xf32>
      %154 = vector.broadcast %153 : vector<2x1xf32> to vector<2x64xf32>
      %155 = arith.subf %147, %154 : vector<2x64xf32>
      %156 = arith.mulf %155, %155 : vector<2x64xf32>
      %cst_64 = arith.constant dense<0.000000e+00> : vector<2xf32>
      %157 = vector.multi_reduction <add>, %156, %cst_64 [1] : vector<2x64xf32> to vector<2xf32>
      %158 = vector.shape_cast %157 : vector<2xf32> to vector<2x1xf32>
      %cst_65 = arith.constant 6.400000e+01 : f32
      %159 = vector.broadcast %cst_65 : f32 to vector<2x1xf32>
      %160 = arith.divf %158, %159 : vector<2x1xf32>
      %161 = vector.broadcast %153 : vector<2x1xf32> to vector<2x64xf32>
      %162 = arith.subf %147, %161 : vector<2x64xf32>
      %cst_66 = arith.constant 9.99999974E-6 : f32
      %163 = vector.broadcast %cst_66 : f32 to vector<2x1xf32>
      %164 = arith.addf %160, %163 : vector<2x1xf32>
      %165 = math.rsqrt %164 : vector<2x1xf32>
      %166 = vector.broadcast %165 : vector<2x1xf32> to vector<2x64xf32>
      %167 = arith.mulf %162, %166 : vector<2x64xf32>
      %168 = vector.broadcast %148 : vector<1x64xf32> to vector<2x64xf32>
      %169 = arith.mulf %167, %168 : vector<2x64xf32>
      %170 = vector.broadcast %149 : vector<1x64xf32> to vector<2x64xf32>
      %171 = arith.addf %169, %170 : vector<2x64xf32>
      %172 = arith.truncf %171 : vector<2x64xf32> to vector<2x64xbf16>
      %c0_67 = arith.constant 0 : index
      %c0_68 = arith.constant 0 : index
      %173 = vector.load %arg15[%c0_67, %c0_68] : memref<64x10xbf16, #tpu.memory_space<vmem>>, vector<64x10xbf16>
      %cst_69 = arith.constant dense<0.000000e+00> : vector<2x10xf32>
      %174 = tpu.matmul %172, %173, %cst_69 {dimension_numbers = #tpu.dot_dimension_numbers<[1], [0], [0], [1], [0, 0, 1, 1], [], []>} : vector<2x64xbf16>, vector<64x10xbf16>, vector<2x10xf32> -> vector<2x10xf32>
      %c0_70 = arith.constant 0 : index
      %c0_71 = arith.constant 0 : index
      %175 = vector.load %arg16[%c0_70, %c0_71] : memref<1x10xf32, #tpu.memory_space<vmem>>, vector<1x10xf32>
      %176 = vector.broadcast %175 : vector<1x10xf32> to vector<2x10xf32>
      %177 = arith.addf %174, %176 : vector<2x10xf32>
      %c0_72 = arith.constant 0 : index
      %c0_73 = arith.constant 0 : index
      %c0_74 = arith.constant 0 : index
      %178 = vector.load %arg17[%c0_72, %c0_73, %c0_74] : memref<1x2x10xf32, #tpu.memory_space<vmem>>, vector<1x2x10xf32>
      %179 = vector.shape_cast %178 : vector<1x2x10xf32> to vector<2x10xf32>
      %180 = vector.shape_cast %177 : vector<2x10xf32> to vector<1x2x10xf32>
      tpu.vector_store %arg17[%c0_72, %c0_73, %c0_74], %180 {strides = array<i32>} : memref<1x2x10xf32, #tpu.memory_space<vmem>>, vector<1x2x10xf32>,
    } else {
    }
    return
  }
  func.func @transform_0(%arg0: i32, %arg1: i32) -> (i32, i32, i32) {
    %c0_i32 = arith.constant 0 : i32
    %c0_i32_0 = arith.constant 0 : i32
    %c0_i32_1 = arith.constant 0 : i32
    return %arg0, %c0_i32, %c0_i32_0 : i32, i32, i32
  }
  func.func @transform_1(%arg0: i32, %arg1: i32) -> (i32, i32, i32) {
    %c0_i32 = arith.constant 0 : i32
    %c0_i32_0 = arith.constant 0 : i32
    %c0_i32_1 = arith.constant 0 : i32
    return %arg1, %c0_i32, %c0_i32_0 : i32, i32, i32
  }
  func.func @transform_2(%arg0: i32, %arg1: i32) -> (i32, i32, i32) {
    %c0_i32 = arith.constant 0 : i32
    %c0_i32_0 = arith.constant 0 : i32
    %c0_i32_1 = arith.constant 0 : i32
    return %arg1, %c0_i32, %c0_i32_0 : i32, i32, i32
  }
  func.func @transform_3(%arg0: i32, %arg1: i32) -> (i32, i32, i32) {
    %c0_i32 = arith.constant 0 : i32
    %c0_i32_0 = arith.constant 0 : i32
    %c0_i32_1 = arith.constant 0 : i32
    return %arg1, %c0_i32, %c0_i32_0 : i32, i32, i32
  }
  func.func @transform_4(%arg0: i32, %arg1: i32) -> (i32, i32, i32) {
    %c0_i32 = arith.constant 0 : i32
    %c0_i32_0 = arith.constant 0 : i32
    %c0_i32_1 = arith.constant 0 : i32
    return %arg1, %c0_i32, %c0_i32_0 : i32, i32, i32
  }
  func.func @transform_5(%arg0: i32, %arg1: i32) -> (i32, i32, i32) {
    %c0_i32 = arith.constant 0 : i32
    %c0_i32_0 = arith.constant 0 : i32
    %c0_i32_1 = arith.constant 0 : i32
    return %arg1, %c0_i32, %c0_i32_0 : i32, i32, i32
  }
  func.func @transform_6(%arg0: i32, %arg1: i32) -> (i32, i32, i32) {
    %c0_i32 = arith.constant 0 : i32
    %c0_i32_0 = arith.constant 0 : i32
    %c0_i32_1 = arith.constant 0 : i32
    return %arg1, %c0_i32, %c0_i32_0 : i32, i32, i32
  }
  func.func @transform_7(%arg0: i32, %arg1: i32) -> (i32, i32, i32) {
    %c0_i32 = arith.constant 0 : i32
    %c0_i32_0 = arith.constant 0 : i32
    %c0_i32_1 = arith.constant 0 : i32
    return %arg1, %c0_i32, %c0_i32_0 : i32, i32, i32
  }
  func.func @transform_8(%arg0: i32, %arg1: i32) -> (i32, i32, i32) {
    %c0_i32 = arith.constant 0 : i32
    %c0_i32_0 = arith.constant 0 : i32
    %c0_i32_1 = arith.constant 0 : i32
    return %arg1, %c0_i32, %c0_i32_0 : i32, i32, i32
  }
  func.func @transform_9(%arg0: i32, %arg1: i32) -> (i32, i32, i32) {
    %c0_i32 = arith.constant 0 : i32
    %c0_i32_0 = arith.constant 0 : i32
    %c0_i32_1 = arith.constant 0 : i32
    return %arg1, %c0_i32, %c0_i32_0 : i32, i32, i32
  }
  func.func @transform_10(%arg0: i32, %arg1: i32) -> (i32, i32, i32) {
    %c0_i32 = arith.constant 0 : i32
    %c0_i32_0 = arith.constant 0 : i32
    %c0_i32_1 = arith.constant 0 : i32
    return %arg1, %c0_i32, %c0_i32_0 : i32, i32, i32
  }
  func.func @transform_11(%arg0: i32, %arg1: i32) -> (i32, i32) {
    %c0_i32 = arith.constant 0 : i32
    %c0_i32_0 = arith.constant 0 : i32
    %c0_i32_1 = arith.constant 0 : i32
    return %c0_i32, %c0_i32_0 : i32, i32
  }
  func.func @transform_12(%arg0: i32, %arg1: i32) -> (i32, i32) {
    %c0_i32 = arith.constant 0 : i32
    %c0_i32_0 = arith.constant 0 : i32
    %c0_i32_1 = arith.constant 0 : i32
    return %c0_i32, %c0_i32_0 : i32, i32
  }
  func.func @transform_13(%arg0: i32, %arg1: i32) -> (i32, i32) {
    %c0_i32 = arith.constant 0 : i32
    %c0_i32_0 = arith.constant 0 : i32
    %c0_i32_1 = arith.constant 0 : i32
    return %c0_i32, %c0_i32_0 : i32, i32
  }
  func.func @transform_14(%arg0: i32, %arg1: i32) -> (i32, i32) {
    %c0_i32 = arith.constant 0 : i32
    %c0_i32_0 = arith.constant 0 : i32
    %c0_i32_1 = arith.constant 0 : i32
    return %c0_i32, %c0_i32_0 : i32, i32
  }
  func.func @transform_15(%arg0: i32, %arg1: i32) -> (i32, i32, i32) {
    %c0_i32 = arith.constant 0 : i32
    %c0_i32_0 = arith.constant 0 : i32
    %c0_i32_1 = arith.constant 0 : i32
    return %arg0, %c0_i32, %c0_i32_0 : i32, i32, i32
  }
}

</mosaic_0001>

<bundles_post_ra>
// kernel: mul.22
= control target key start
LH: loop header
LB: loop body
LE: loop exit
PB: predicated region body
PF: predicated region fallthrough
CT: control target
= control target key end

     0   :  { %vm7_vm0 = vcmask 31744   ;;  %s37_s8 = smov 4   ;;  %s38_s9 = smov 8   ;;  %vm13_vm1 = vcmask 130144   ;;  %vm19_vm2 = vcmask 97344   ;;  %vm25_vm3 = vcmask 64544   ;;  %s55_s0 = inlined_call_operand.vmem [shape: f32[4,4], index: 0, kind: input, shape index: {}]   ;;  %s56_s1 = inlined_call_operand.vmem [shape: f32[16], index: 1, kind: output, shape index: {}]  }
   0x1   :  { %v4_v0 = vld [vmem:[%s55_s0] sm:$0xf]  ;;  %s36_s0 = smov 12  }
   0x2   :  { %5 = vst [vmem:[#allocation1] sm:$0xf] %v4_v0 }
   0x9   :  { %v10_v1 = vld [vmem:[#allocation1 + $0x3] sm:$0x1]   ;;  %v22_v2 = vld [vmem:[#allocation1 + $0x1] sm:$0x1]   ;;  %v6_v3 = vld [vmem:[#allocation1] sm:$0x1]  }
   0xa   :  { %11 = vrot.lane.b32.xlu0 %v10_v1, %s36_s0  ;;  %23 = vrot.lane.b32.xlu1 %v22_v2, %s37_s8  ;;  %v16_v4 = vld [vmem:[#allocation1 + $0x2] sm:$0x1]   ;;  %8 = vst.msk [vmem:[#allocation0] sm:$0x1] %vm7_vm0, %v6_v3  }
   0xe   :  { %17 = vrot.lane.b32.xlu0 %v16_v4, %s38_s9 }
  0x7c   :  { %v12_v5 = vpop.permute.xlu0 %11   ;;  %v24_v6 = vpop.permute.xlu1 %23  }
  0x7d   :  { %14 = vst.msk [vmem:[#allocation0] sm:$0x1] %vm13_vm1, %v12_v5  }
  0x80   :  { %v18_v7 = vpop.permute.xlu0 %17  }
  0x81   :  { %20 = vst.msk [vmem:[#allocation0] sm:$0x1] %vm19_vm2, %v18_v7  }
  0x82   :  { %26 = vst.msk [vmem:[#allocation0] sm:$0x1] %vm25_vm3, %v24_v6  }
  0x89   :  { %v30_v8 = vld [vmem:[#allocation0] sm:$0x1] }
  0x8a   :  { %32 = vst [vmem:[%s56_s1] sm:$0x1] %v30_v8 }

// kernel: vit_forward.1
= control target key start
LH: loop header
LB: loop body
LE: loop exit
PB: predicated region body
PF: predicated region fallthrough
CT: control target
= control target key end

     0   :  { %s3938_s0 = inlined_call_operand.vmem [shape: f32[1,32,64], index: 0, kind: input, shape index: {}]   ;;  %s3939_s1 = inlined_call_operand.vmem [shape: f32[2,1,64], index: 1, kind: input, shape index: {}]   ;;  %s3940_s2 = inlined_call_operand.vmem [shape: f32[2,1,64], index: 2, kind: input, shape index: {}]   ;;  %s3941_s3 = inlined_call_operand.vmem [shape: bf16[2,64,192], index: 3, kind: input, shape index: {}]   ;;  %s3942_s4 = inlined_call_operand.vmem [shape: bf16[2,64,64], index: 4, kind: input, shape index: {}]   ;;  %s3943_s5 = inlined_call_operand.vmem [shape: f32[2,1,64], index: 5, kind: input, shape index: {}]   ;;  %s3944_s6 = inlined_call_operand.vmem [shape: f32[2,1,64], index: 6, kind: input, shape index: {}]   ;;  %s3945_s7 = inlined_call_operand.vmem [shape: bf16[2,64,128], index: 7, kind: input, shape index: {}]   ;;  %s3946_s8 = inlined_call_operand.vmem [shape: f32[2,1,128], index: 8, kind: input, shape index: {}]   ;;  %s3947_s9 = inlined_call_operand.vmem [shape: bf16[2,128,64], index: 9, kind: input, shape index: {}]   ;;  %s3948_s10 = inlined_call_operand.vmem [shape: f32[2,1,64], index: 10, kind: input, shape index: {}]   ;;  %s3949_s11 = inlined_call_operand.vmem [shape: f32[1,64], index: 11, kind: input, shape index: {}]   ;;  %s3950_s12 = inlined_call_operand.vmem [shape: f32[1,64], index: 12, kind: input, shape index: {}]   ;;  %s3951_s13 = inlined_call_operand.vmem [shape: bf16[64,10], index: 13, kind: input, shape index: {}]   ;;  %s3952_s14 = inlined_call_operand.vmem [shape: f32[1,10], index: 14, kind: input, shape index: {}]   ;;  %s3953_s15 = inlined_call_operand.hbm [shape: f32[1,2,10], index: 15, kind: output, shape index: {}]  }
   0x1   :  { %3957 = sst [smem:[#allocation9_spill]] %s3941_s3 }
   0x2   :  { %3958 = sst [smem:[#allocation10_spill]] %s3942_s4 }
   0x3   :  { %3959 = sst [smem:[#allocation11_spill]] %s3949_s11 }
   0x4   :  { %3960 = sst [smem:[#allocation12_spill]] %s3950_s12 }
   0x5   :  { %3961 = sst [smem:[#allocation13_spill]] %s3952_s14 }
   0x6   :  { %3962 = sst [smem:[#allocation14_spill]] %s3953_s15 }
   0x7   :  { %20 = vsyncpa [#allocation4], 0  ;;  %s3373_s18 = smov 0   ;;  %s3375_s19 = smov 0  }
   0x8   :  { %s3377_s20 = smov 0  }
   0x9 LB: > { %3963 = sst [smem:[#allocation6_spill]] %s3274_s19  ;;  %s35_s22 = sadd.s32 1, %s3274_s19  ;;  %s3278_s20 = sphi %s3377_s20, %s26_s20   ;;  %s3274_s19 = sphi %s3375_s19, %s3980_s19   ;;  %s3270_s18 = sphi %s3373_s18, %s3979_s18  }
   0xa   : > { %3964 = sst [smem:[#allocation7_spill]] %s3278_s20  ;;  %p36_p0 = scmp.ge.s32.totalorder %s35_s22, 2 }
   0xb   : > { %p2677_p1 = scmp.ge.s32.totalorder %s3278_s20, 1  ;;  %p538_p2 = scmp.lt.s32.totalorder %s3278_s20, 3 }
   0xc   : > { %s3982_s22 = smov (%p36_p0, %s35_s22), 0 }
   0xd   : > { %3965 = sst [smem:[#allocation8_spill]] %s3982_s22  ;;  %p539_p3 = pnand %p2677_p1, %p538_p2 }
   0xe   : > { %p624_p4 = scmp.lt.s32.totalorder (!%p539_p3), %s3270_s18, 1  ;;  %s3966_s3 = sld [smem:[#allocation9_spill]] (!%p539_p3) }
   0xf   : > { %542 = sbr.rel (%p539_p3) target bundleno = 3325 (0xcfd), region = 80  ;;  %s3967_s4 = sld [smem:[#allocation10_spill]] (!%p539_p3) }
  0x10   : > { %p2686_p5 = scmp.ne.s32.totalorder (!%p539_p3), %s3270_s18, 0 }
  0x16   : > { %s3396_s23 = scalar_select %p624_p4, %s3270_s18, 1 }
  0x17   : > { %666 = sbr.rel (%p2686_p5) target bundleno = 30 (0x1e), region = 84  ;;  %v667_v0 = vld [vmem:[%s3938_s0] sm:$0xff] (!%p2686_p5)  ;;  %vm671_vm0 = vcmask (!%p2686_p5), 523264   ;;  %v668_v1 = vld [vmem:[%s3938_s0 + $0x8] sm:$0xff] (!%p2686_p5)  ;;  %v669_v2 = vld [vmem:[%s3938_s0 + $0x10] sm:$0xff] (!%p2686_p5) }
  0x18   : > { %s2752_s30 = sshll.u32 %s3396_s23, 6  ;;  %s2753_s16 = sshll.u32 %s3396_s23, 5  ;;  %672 = vst.msk [vmem:[#allocation2] sm:$0xff] (!%p2686_p5), %vm671_vm0, %v667_v0  ;;  %673 = vst.msk [vmem:[#allocation2 + $0x8] sm:$0xff] (!%p2686_p5), %vm671_vm0, %v668_v1  ;;  %v670_v3 = vld [vmem:[%s3938_s0 + $0x18] sm:$0xff] (!%p2686_p5) }
  0x19   : > { %s3411_s22 = scalar_lea.vmem %s3966_s3, %s2752_s30  ;;  %s3416_s19 = scalar_lea.vmem %s3967_s4, %s2753_s16  ;;  %674 = vst.msk [vmem:[#allocation2 + $0x10] sm:$0xff] (!%p2686_p5), %vm671_vm0, %v669_v2  ;;  %675 = vst.msk [vmem:[#allocation2 + $0x18] sm:$0xff] (!%p2686_p5), %vm671_vm0, %v670_v3 }
  0x1a   : > { %s645_s27 = scalar_lea.vmem %s3944_s6, %s3396_s23  ;;  %s3429_s11 = scalar_lea.vmem %s3945_s7, %s2753_s16 }
  0x1b   : > { %s653_s3 = scalar_lea.vmem %s3946_s8, %s3396_s23  ;;  %s3438_s4 = scalar_lea.vmem %s3947_s9, %s2752_s30 }
  0x1c   : > { %s661_s26 = scalar_lea.vmem %s3948_s10, %s3396_s23 }
  0x1e PF: > { %vm682_vm1 = vcmask 523264   ;;  %v3100_v32 = vld [vmem:[%s3411_s22 + $0x4] ss:$8 sps:$4 sm:$0xff]   ;;  %v3102_v33 = vld [vmem:[%s3411_s22] ss:$8 sps:$4 sm:$0xff]   ;;  %v3280_v40 = vmov 0   ;;  %s3968_s25 = scalar_lea.vmem %s3939_s1, %s3396_s23  ;;  %s3969_s12 = scalar_lea.vmem %s3940_s2, %s3396_s23 }
  0x1f   : > { %v676_v4 = vld [vmem:[#allocation2] sm:$0xff]  ;;  %v677_v6 = vld [vmem:[#allocation2 + $0x8] sm:$0xff]  ;;  %812 = vmatprep.subr.bf16.mxu0 %v3100_v32  ;;  %v3103_v34 = vld [vmem:[%s3411_s22 + $0x14] ss:$8 sps:$4 sm:$0xff]   ;;  %844 = vmatprep.mubr.bf16.mxu0 %v3280_v40  ;;  %s3282_s14 = smov 112   ;;  %vm3283_vm2 = vmmov 0  }
  0x20   : > { %v678_v5 = vld [vmem:[#allocation2 + $0x10] sm:$0xff]  ;;  %v683_v7 = vsel %vm682_vm1, %v676_v4, 0.0  ;;  %v679_v9 = vld [vmem:[#allocation2 + $0x18] sm:$0xff]  ;;  %v686_v10 = vsel %vm682_vm1, %v677_v6, 0.0  ;;  %813 = vmatpush1.bf16.msra.mxu0 %v3102_v33  ;;  %v3106_v36 = vld [vmem:[%s3411_s22 + $0x24] ss:$8 sps:$4 sm:$0xff]  }
  0x21   : > { %v689_v8 = vsel %vm682_vm1, %v678_v5, 0.0  ;;  %684 = vadd.xlane.f32.xlu0 %v683_v7  ;;  %v692_v11 = vsel %vm682_vm1, %v679_v9, 0.0  ;;  %v3105_v35 = vld [vmem:[%s3411_s22 + $0x10] ss:$8 sps:$4 sm:$0xff]   ;;  %814 = vmatprep.subr.bf16.mxu0 %v3103_v34  ;;  %v3108_v37 = vld [vmem:[%s3411_s22 + $0x20] ss:$8 sps:$4 sm:$0xff]  }
  0x22   : > { %690 = vadd.xlane.f32.xlu1 %v689_v8  ;;  %v3109_v38 = vld [vmem:[%s3411_s22 + $0x34] ss:$8 sps:$4 sm:$0xff]   ;;  %v3111_v39 = vld [vmem:[%s3411_s22 + $0x30] ss:$8 sps:$4 sm:$0xff]   ;;  %v2687_v55 = vld [vmem:[%s3968_s25] ss:$0 sm:$0xff]  ;;  %s3970_s22 = scalar_lea.vmem %s3943_s5, %s3396_s23 }
  0x23   : > { %v2688_v60 = vld [vmem:[%s3969_s12] ss:$0 sm:$0xff]  ;;  %s3284_s29 = smov 80   ;;  %s3285_s16 = smov 64   ;;  %vm964_vm3 = vcmask 130048   ;;  %vm1950_vm4 = vcmask 261120  }
  0x24   : > { %815 = vmatpush1.bf16.msra.mxu0 %v3105_v35  ;;  %s3286_s28 = smov 96   ;;  %s3287_s21 = smov 16   ;;  %vm1955_vm5 = vcmask 392192  }
  0x25   : > { %687 = vadd.xlane.f32.xlu0 %v686_v10  ;;  %816 = vmatprep.subr.bf16.mxu0 %v3106_v36  ;;  %s3288_s30 = smov 32   ;;  %s3289_s17 = smov 48  }
  0x26   : > { %693 = vadd.xlane.f32.xlu1 %v692_v11  ;;  %v3281_v11 = vmov 0.0   ;;  %p2739_p6 = scmp.ne.s32.totalorder %s3270_s18, 1 }
  0x27   : > { %2821 = vmatprep.subr.bf16.mxu1 %v3281_v11  ;;  %2823 = vmatprep.mubr.msk.bf16.mxu1 %vm3283_vm2, %v3281_v11  ;;  %vm2396_vm6 = vcmask (!%p2739_p6), 517120   ;;  %vm3291_vm7 = vmmov (!%p2739_p6), 0   ;;  %s3973_s25 = sld [smem:[#allocation13_spill]] (!%p2739_p6)  ;;  %vm2507_vm8 = vcmask (!%p2739_p6), 74752  }
  0x28   : > { %817 = vmatpush1.bf16.msra.mxu0 %v3108_v37 }
  0x29   : > { %818 = vmatprep.subr.bf16.mxu0 %v3109_v38 }
  0x2c   : > { %819 = vmatpush1.bf16.msra.mxu0 %v3111_v39 }
  0x2d   : > { %2815 = vmatprep.subr.bf16.mxu0 %v3281_v11 }
  0xae   : > { %v685_v12 = vpop.xlane.xlu0 %684 }
  0xaf   : > { %v691_v13 = vpop.xlane.xlu1 %690  ;;  %v696_v14 = vmul.f32 0.015625, %v685_v12 }
  0xb0   : > { %v698_v15 = vmul.f32 0.015625, %v691_v13 }
  0xb1   : > { %v700_v16 = vsub.f32 %v676_v4, %v696_v14 }
  0xb2   : > { %v3461_v17 = vsub.f32 %v678_v5, %v698_v15  ;;  %v688_v18 = vpop.xlane.xlu0 %687 }
  0xb3   : > { %v694_v19 = vpop.xlane.xlu1 %693  ;;  %v697_v20 = vmul.f32 0.015625, %v688_v18  ;;  %v704_v22 = vmul.f32 %v700_v16, %v700_v16 }
  0xb4   : > { %v699_v21 = vmul.f32 0.015625, %v694_v19  ;;  %v706_v23 = vmul.f32 %v3461_v17, %v3461_v17 }
  0xb5   : > { %v701_v24 = vsub.f32 %v677_v6, %v697_v20  ;;  %v708_v26 = vsel %vm682_vm1, %v704_v22, 0.0 }
  0xb6   : > { %v703_v25 = vsub.f32 %v679_v9, %v699_v21  ;;  %709 = vadd.xlane.f32.xlu0 %v708_v26  ;;  %v714_v27 = vsel %vm682_vm1, %v706_v23, 0.0 }
  0xb7   : > { %v705_v28 = vmul.f32 %v701_v24, %v701_v24 }
  0xb8   : > { %v707_v29 = vmul.f32 %v703_v25, %v703_v25 }
  0xb9   : > { %v711_v30 = vsel %vm682_vm1, %v705_v28, 0.0 }
  0xba   : > { %715 = vadd.xlane.f32.xlu0 %v714_v27  ;;  %712 = vadd.xlane.f32.xlu1 %v711_v30  ;;  %v717_v31 = vsel %vm682_vm1, %v707_v29, 0.0 }
  0xbe   : > { %718 = vadd.xlane.f32.xlu1 %v717_v31 }
 0x143   : > { %v710_v41 = vpop.xlane.xlu0 %709 }
 0x144   : > { %v720_v42 = vmul.f32 0.015625, %v710_v41 }
 0x146   : > { %v724_v43 = vadd.f32 1e-05, %v720_v42 }
 0x147   : > { %v713_v44 = vpop.xlane.xlu1 %712  ;;  %v716_v45 = vpop.xlane.xlu0 %715 }
 0x148   : > { %3128 = vrsqrt.f32 %v724_v43  ;;  %v721_v46 = vmul.f32 0.015625, %v713_v44  ;;  %v722_v47 = vmul.f32 0.015625, %v716_v45 }
 0x14a   : > { %v725_v48 = vadd.f32 1e-05, %v721_v46  ;;  %v726_v49 = vadd.f32 1e-05, %v722_v47 }
 0x14b   : > { %v719_v50 = vpop.xlane.xlu1 %718 }
 0x14c   : > { %3130 = vrsqrt.f32 %v725_v48  ;;  %v723_v51 = vmul.f32 0.015625, %v719_v50 }
 0x14d   : > { %3132 = vrsqrt.f32 %v726_v49 }
 0x14e   : > { %v727_v52 = vadd.f32 1e-05, %v723_v51 }
 0x150   : > { %3134 = vrsqrt.f32 %v727_v52 }
 0x152   : > { %v3129_v53 = vpop.eup %3128 }
 0x153   : > { %v732_v54 = vmul.f32 %v3129_v53, %v700_v16 }
 0x155   : > { %v742_v58 = vmul.f32 %v2687_v55, %v732_v54 }
 0x156   : > { %v3131_v56 = vpop.eup %3130 }
 0x157   : > { %v733_v57 = vmul.f32 %v3131_v56, %v701_v24  ;;  %v3133_v59 = vpop.eup %3132  ;;  %v752_v1 = vadd.f32 %v2688_v60, %v742_v58 }
 0x158   : > { %v734_v63 = vmul.f32 %v3133_v59, %v3461_v17 }
 0x159   : > { %v743_v61 = vmul.f32 %v2687_v55, %v733_v57 }
 0x15a   : > { %v3135_v62 = vpop.eup %3134  ;;  %v744_v5 = vmul.f32 %v2687_v55, %v734_v63 }
 0x15b   : > { %v735_v0 = vmul.f32 %v3135_v62, %v703_v25  ;;  %v753_v2 = vadd.f32 %v2688_v60, %v743_v61 }
 0x15c   : > { %v754_v7 = vadd.f32 %v2688_v60, %v744_v5 }
 0x15d   : > { %v756_v3 = vpack.c.bf16 %v753_v2, %v752_v1  ;;  %v745_v4 = vmul.f32 %v2687_v55, %v735_v0 }
 0x15f   : > { %2697 = vmatmul.mubr.msk.bf16.vlgmr.msra.gmra.mrb[0].mxu0 %vm682_vm1, %v756_v3  ;;  %v755_v6 = vadd.f32 %v2688_v60, %v745_v4 }
 0x160   : > { %854 = vmatprep.mubr.bf16.mxu0 %v3280_v40 }
 0x161   : > { %v757_v8 = vpack.c.bf16 %v755_v6, %v754_v7 }
 0x167   : > { %2698 = vmatmul.mubr.msk.bf16.gmra.mrb[4].mxu0 %vm682_vm1, %v757_v8 }
 0x168   : > { %2817 = vmatprep.mubr.msk.bf16.mxu0 %vm3283_vm2, %v3281_v11 }
 0x232   : > { %v846_v9 = vpop.f32.mrb[0].mxu0 }
 0x233   : > { %v3490_v10 = vpop.f32.mrb[1].mxu0 }
 0x234   : > { %v850_v12 = vpop.f32.mrb[2].mxu0 }
 0x235   : > { %v3494_v13 = vpop.f32.mrb[3].mxu0  ;;  %v3010_v14 = vpack.i.bf16 %v850_v12, %v846_v9  ;;  %v905_v15 = vpack.c.bf16 %v850_v12, %v846_v9 }
 0x236   : > { %v953_v16 = vpack.c.bf16 %v3494_v13, %v3490_v10  ;;  %v3500_v17 = vpack.i.bf16 %v3494_v13, %v3490_v10 }
 0x237   : > { %3011 = vrot.lane.b32.xlu0 %v3010_v14, %s3282_s14 }
 0x23a   : > { %v856_v18 = vpop.f32.mrb[4].mxu0 }
 0x23b   : > { %3031 = vrot.lane.b32.xlu0 %v3010_v14, %s3284_s29  ;;  %v3508_v19 = vpop.f32.mrb[5].mxu0 }
 0x23c   : > { %v860_v20 = vpop.f32.mrb[6].mxu0 }
 0x23d   : > { %v3510_v21 = vpop.f32.mrb[7].mxu0  ;;  %v3015_v22 = vpack.i.bf16 %v860_v20, %v856_v18  ;;  %v906_v23 = vpack.c.bf16 %v860_v20, %v856_v18 }
 0x23e   : > { %v954_v24 = vpack.c.bf16 %v3510_v21, %v3508_v19  ;;  %v3516_v25 = vpack.i.bf16 %v3510_v21, %v3508_v19 }
 0x23f   : > { %962 = vrot.lane.b32.xlu0 %v905_v15, %s3285_s16  ;;  %3016 = vrot.lane.b32.xlu1 %v3015_v22, %s3282_s14 }
 0x243   : > { %3021 = vrot.lane.b32.xlu1 %v3010_v14, %s3286_s28 }
 0x247   : > { %3026 = vrot.lane.b32.xlu1 %v3015_v22, %s3286_s28 }
 0x24b   : > { %3036 = vrot.lane.b32.xlu1 %v3015_v22, %s3284_s29 }
 0x24f   : > { %1013 = vrot.lane.b32.xlu1 %v906_v23, %s3285_s16 }
 0x2a9   : > { %v3012_v26 = vpop.permute.xlu0 %3011 }
 0x2aa   : > { %v3014_v27 = vunpack.i.h.bf16 %v3012_v26  ;;  %v3013_v28 = vunpack.i.l.bf16 %v3012_v26 }
 0x2ac   : > { %v907_v29 = vpack.c.bf16 %v3014_v27, %v3013_v28 }
 0x2ad   : > { %v3032_v30 = vpop.permute.xlu0 %3031 }
 0x2ae   : > { %1063 = vrot.lane.b32.xlu0 %v907_v29, %s3285_s16  ;;  %v3034_v40 = vunpack.i.h.bf16 %v3032_v30  ;;  %v3033_v41 = vunpack.i.l.bf16 %v3032_v30 }
 0x2b0   : > { %v911_v46 = vpack.c.bf16 %v3034_v40, %v3033_v41 }
 0x2b1   : > { %v3017_v31 = vpop.permute.xlu1 %3016  ;;  %v963_v32 = vpop.permute.xlu0 %962 }
 0x2b2   : > { %v3019_v33 = vunpack.i.h.bf16 %v3017_v31  ;;  %v3018_v34 = vunpack.i.l.bf16 %v3017_v31  ;;  %v969_v35 = vsel %vm964_vm3, %v963_v32, 0 }
 0x2b3   : > { %2816 = vmatpush3.bf16.xpose.msra.mxu0 %v969_v35 }
 0x2b4   : > { %v908_v36 = vpack.c.bf16 %v3019_v33, %v3018_v34  ;;  %2833 = vmatprep.subr.bf16.mxu0 %v3281_v11 }
 0x2b5   : > { %v3022_v37 = vpop.permute.xlu1 %3021 }
 0x2b6   : > { %v3024_v38 = vunpack.i.h.bf16 %v3022_v37  ;;  %v3023_v39 = vunpack.i.l.bf16 %v3022_v37  ;;  %1113 = vrot.lane.b32.xlu1 %v908_v36, %s3285_s16 }
 0x2b8   : > { %v909_v42 = vpack.c.bf16 %v3024_v38, %v3023_v39 }
 0x2b9   : > { %v3027_v43 = vpop.permute.xlu1 %3026 }
 0x2ba   : > { %v3029_v44 = vunpack.i.h.bf16 %v3027_v43  ;;  %v3028_v45 = vunpack.i.l.bf16 %v3027_v43  ;;  %2818 = vmatmul.mubr.msk.bf16.vlgmr.msra.gmra.mrb[8].mxu0 %vm964_vm3, %v905_v15  ;;  %1163 = vrot.lane.b32.xlu0 %v909_v42, %s3285_s16 }
 0x2bb   : > { %2835 = vmatprep.mubr.msk.bf16.mxu0 %vm3283_vm2, %v3281_v11 }
 0x2bc   : > { %v910_v47 = vpack.c.bf16 %v3029_v44, %v3028_v45 }
 0x2bd   : > { %v3037_v48 = vpop.permute.xlu1 %3036 }
 0x2be   : > { %v3039_v49 = vunpack.i.h.bf16 %v3037_v48  ;;  %v3038_v50 = vunpack.i.l.bf16 %v3037_v48  ;;  %1213 = vrot.lane.b32.xlu1 %v910_v47, %s3285_s16  ;;  %1263 = vrot.lane.b32.xlu0 %v911_v46, %s3285_s16 }
 0x2c0   : > { %v912_v51 = vpack.c.bf16 %v3039_v49, %v3038_v50 }
 0x2c1   : > { %v1014_v52 = vpop.permute.xlu1 %1013 }
 0x2c2   : > { %1313 = vrot.lane.b32.xlu1 %v912_v51, %s3285_s16  ;;  %v1019_v53 = vsel %vm964_vm3, %v1014_v52, 0 }
 0x2c3   : > { %2822 = vmatpush3.bf16.xpose.msra.mxu1 %v1019_v53 }
 0x2c4   : > { %2827 = vmatprep.subr.bf16.mxu1 %v3281_v11 }
 0x2ca   : > { %2824 = vmatmul.mubr.msk.bf16.vlgmr.msra.gmra.mrb[0].mxu1 %vm964_vm3, %v906_v23 }
 0x2cb   : > { %2829 = vmatprep.mubr.msk.bf16.mxu1 %vm3283_vm2, %v3281_v11 }
 0x320   : > { %v1064_v54 = vpop.permute.xlu0 %1063 }
 0x321   : > { %v1069_v55 = vsel %vm964_vm3, %v1064_v54, 0 }
 0x322   : > { %2828 = vmatpush3.bf16.xpose.msra.mxu1 %v1069_v55 }
 0x323   : > { %2839 = vmatprep.subr.bf16.mxu1 %v3281_v11 }
 0x328   : > { %v1114_v56 = vpop.permute.xlu1 %1113 }
 0x329   : > { %v1119_v57 = vsel %vm964_vm3, %v1114_v56, 0  ;;  %2830 = vmatmul.mubr.msk.bf16.vlgmr.msra.gmra.mrb[4].mxu1 %vm964_vm3, %v907_v29 }
 0x32a   : > { %2834 = vmatpush3.bf16.xpose.msra.mxu0 %v1119_v57  ;;  %2841 = vmatprep.mubr.msk.bf16.mxu1 %vm3283_vm2, %v3281_v11 }
 0x32b   : > { %2845 = vmatprep.subr.bf16.mxu0 %v3281_v11 }
 0x32c   : > { %v1164_v58 = vpop.permute.xlu0 %1163 }
 0x32d   : > { %v1169_v59 = vsel %vm964_vm3, %v1164_v58, 0 }
 0x32e   : > { %2840 = vmatpush3.bf16.xpose.msra.mxu1 %v1169_v59 }
 0x32f   : > { %2851 = vmatprep.subr.bf16.mxu1 %v3281_v11 }
 0x330   : > { %v1214_v60 = vpop.permute.xlu1 %1213  ;;  %v1264_v62 = vpop.permute.xlu0 %1263 }
 0x331   : > { %v1219_v61 = vsel %vm964_vm3, %v1214_v60, 0  ;;  %2836 = vmatmul.mubr.msk.bf16.vlgmr.msra.gmra.mrb[12].mxu0 %vm964_vm3, %v908_v36  ;;  %v1269_v63 = vsel %vm964_vm3, %v1264_v62, 0 }
 0x332   : > { %2846 = vmatpush3.bf16.xpose.msra.mxu0 %v1219_v61  ;;  %2847 = vmatprep.mubr.msk.bf16.mxu0 %vm3283_vm2, %v3281_v11 }
 0x333   : > { %2857 = vmatprep.subr.bf16.mxu0 %v3281_v11 }
 0x334   : > { %v1314_v0 = vpop.permute.xlu1 %1313 }
 0x335   : > { %2842 = vmatmul.mubr.msk.bf16.vlgmr.msra.gmra.mrb[8].mxu1 %vm964_vm3, %v909_v42  ;;  %v1319_v1 = vsel %vm964_vm3, %v1314_v0, 0 }
 0x336   : > { %2852 = vmatpush3.bf16.xpose.msra.mxu1 %v1269_v63  ;;  %2853 = vmatprep.mubr.msk.bf16.mxu1 %vm3283_vm2, %v3281_v11 }
 0x337   : > { %2863 = vmatprep.subr.bf16.mxu1 %v3281_v11 }
 0x339   : > { %2848 = vmatmul.mubr.msk.bf16.vlgmr.msra.gmra.mrb[16].mxu0 %vm964_vm3, %v910_v47 }
 0x33a   : > { %2858 = vmatpush3.bf16.xpose.msra.mxu0 %v1319_v1  ;;  %2859 = vmatprep.mubr.msk.bf16.mxu0 %vm3283_vm2, %v3281_v11 }
 0x33b   : > { %2869 = vmatprep.subr.bf16.mxu0 %v3281_v11 }
 0x33d   : > { %2854 = vmatmul.mubr.msk.bf16.vlgmr.msra.gmra.mrb[12].mxu1 %vm964_vm3, %v911_v46 }
 0x33e   : > { %2864 = vmatpush3.bf16.msra.mxu1 %v953_v16  ;;  %2865 = vmatprep.mubr.msk.bf16.mxu1 %vm3283_vm2, %v3281_v11 }
 0x33f   : > { %2875 = vmatprep.subr.bf16.mxu1 %v3281_v11 }
 0x341   : > { %2860 = vmatmul.mubr.msk.bf16.vlgmr.msra.gmra.mrb[20].mxu0 %vm964_vm3, %v912_v51 }
 0x342   : > { %2870 = vmatpush3.bf16.msra.mxu0 %v954_v24  ;;  %2871 = vmatprep.mubr.msk.bf16.mxu0 %vm3283_vm2, %v3281_v11 }
 0x343   : > { %2881 = vmatprep.subr.bf16.mxu0 %v3281_v11 }
 0x38d   : > { %v3578_v2 = vpop.f32.mrb[8].mxu0 }
 0x38e   : > { %v2819_v3 = vpop.f32.mrb[9].mxu0  ;;  %v1362_v4 = vsel %vm964_vm3, %v3578_v2, -inf }
 0x38f   : > { %v3582_v5 = vpop.f32.mrb[10].mxu0  ;;  %1363 = vmax.xlane.f32.xlu0 %v1362_v4 }
 0x390   : > { %v2820_v6 = vpop.f32.mrb[11].mxu0  ;;  %v1365_v7 = vsel %vm964_vm3, %v3582_v5, -inf }
 0x391   : > { %1366 = vmax.xlane.f32.xlu1 %v1365_v7 }
 0x39d   : > { %v3586_v8 = vpop.f32.mrb[0].mxu1 }
 0x39e   : > { %v2825_v9 = vpop.f32.mrb[1].mxu1  ;;  %v1368_v10 = vsel %vm964_vm3, %v3586_v8, -inf }
 0x39f   : > { %v3590_v12 = vpop.f32.mrb[2].mxu1  ;;  %1369 = vmax.xlane.f32.xlu0 %v1368_v10 }
 0x3a0   : > { %v2826_v13 = vpop.f32.mrb[3].mxu1  ;;  %v1371_v14 = vsel %vm964_vm3, %v3590_v12, -inf }
 0x3a3   : > { %1372 = vmax.xlane.f32.xlu0 %v1371_v14 }
 0x3fc   : > { %v3594_v15 = vpop.f32.mrb[4].mxu1 }
 0x3fd   : > { %v2831_v16 = vpop.f32.mrb[5].mxu1  ;;  %v1374_v18 = vsel %vm964_vm3, %v3594_v15, -inf }
 0x3fe   : > { %1375 = vmax.xlane.f32.xlu0 %v1374_v18  ;;  %v3598_v19 = vpop.f32.mrb[6].mxu1 }
 0x3ff   : > { %v2832_v20 = vpop.f32.mrb[7].mxu1  ;;  %v1377_v21 = vsel %vm964_vm3, %v3598_v19, -inf }
 0x400   : > { %1378 = vmax.xlane.f32.xlu1 %v1377_v21 }
 0x404   : > { %v3602_v22 = vpop.f32.mrb[12].mxu0 }
 0x405   : > { %v2837_v23 = vpop.f32.mrb[13].mxu0  ;;  %v1380_v24 = vsel %vm964_vm3, %v3602_v22, -inf }
 0x406   : > { %v3606_v26 = vpop.f32.mrb[14].mxu0  ;;  %1381 = vmax.xlane.f32.xlu0 %v1380_v24 }
 0x407   : > { %v2838_v27 = vpop.f32.mrb[15].mxu0  ;;  %v1383_v28 = vsel %vm964_vm3, %v3606_v26, -inf }
 0x408   : > { %1384 = vmax.xlane.f32.xlu1 %v1383_v28  ;;  %v3610_v29 = vpop.f32.mrb[8].mxu1 }
 0x409   : > { %v2843_v30 = vpop.f32.mrb[9].mxu1  ;;  %v1386_v31 = vsel %vm964_vm3, %v3610_v29, -inf }
 0x40a   : > { %1387 = vmax.xlane.f32.xlu0 %v1386_v31  ;;  %v3614_v32 = vpop.f32.mrb[10].mxu1 }
 0x40b   : > { %v2844_v33 = vpop.f32.mrb[11].mxu1  ;;  %v1389_v34 = vsel %vm964_vm3, %v3614_v32, -inf }
 0x40c   : > { %v3618_v35 = vpop.f32.mrb[16].mxu0  ;;  %1390 = vmax.xlane.f32.xlu1 %v1389_v34 }
 0x40d   : > { %v2849_v36 = vpop.f32.mrb[17].mxu0  ;;  %v1392_v37 = vsel %vm964_vm3, %v3618_v35, -inf }
 0x40e   : > { %v3622_v38 = vpop.f32.mrb[18].mxu0  ;;  %1393 = vmax.xlane.f32.xlu0 %v1392_v37 }
 0x40f   : > { %v2850_v39 = vpop.f32.mrb[19].mxu0  ;;  %v1395_v40 = vsel %vm964_vm3, %v3622_v38, -inf }
 0x410   : > { %1396 = vmax.xlane.f32.xlu1 %v1395_v40  ;;  %v3626_v41 = vpop.f32.mrb[12].mxu1 }
 0x411   : > { %v2855_v42 = vpop.f32.mrb[13].mxu1  ;;  %v1398_v43 = vsel %vm964_vm3, %v3626_v41, -inf }
 0x412   : > { %1399 = vmax.xlane.f32.xlu0 %v1398_v43  ;;  %v3630_v44 = vpop.f32.mrb[14].mxu1 }
 0x413   : > { %v2856_v45 = vpop.f32.mrb[15].mxu1  ;;  %v1401_v46 = vsel %vm964_vm3, %v3630_v44, -inf }
 0x414   : > { %v3634_v47 = vpop.f32.mrb[20].mxu0  ;;  %1402 = vmax.xlane.f32.xlu1 %v1401_v46 }
 0x415   : > { %v2861_v48 = vpop.f32.mrb[21].mxu0  ;;  %v1404_v49 = vsel %vm964_vm3, %v3634_v47, -inf }
 0x416   : > { %v3638_v50 = vpop.f32.mrb[22].mxu0  ;;  %1405 = vmax.xlane.f32.xlu0 %v1404_v49 }
 0x417   : > { %v2862_v51 = vpop.f32.mrb[23].mxu0  ;;  %v1407_v61 = vsel %vm964_vm3, %v3638_v50, -inf }
 0x41c   : > { %v1364_v52 = vpop.xlane.xlu0 %1363 }
 0x41d   : > { %v1410_v53 = vsub.f32 %v3578_v2, %v1364_v52 }
 0x41e   : > { %v1367_v63 = vpop.xlane.xlu1 %1366 }
 0x41f   : > { %v1426_v55 = vmul.f32 1.442695, %v1410_v53  ;;  %v1411_v0 = vsub.f32 %v3582_v5, %v1367_v63 }
 0x421   : > { %3136 = vpow2.f32 %v1426_v55  ;;  %v1428_v2 = vmul.f32 1.442695, %v1411_v0 }
 0x425   : > { %3046 = vrot.lane.b32.xlu1 %v3516_v25, %s3282_s14 }
 0x429   : > { %3051 = vrot.lane.b32.xlu1 %v3500_v17, %s3286_s28 }
 0x42b   : > { %v3648_v58 = vpop.eup %3136 }
 0x42c   : > { %3041 = vrot.lane.b32.xlu0 %v3500_v17, %s3282_s14  ;;  %v1370_v54 = vpop.xlane.xlu0 %1369  ;;  %v1458_v59 = vsel %vm964_vm3, %v3648_v58, 0.0 }
 0x42d   : > { %v1412_v56 = vsub.f32 %v3586_v8, %v1370_v54 }
 0x42f   : > { %v1430_v57 = vmul.f32 1.442695, %v1412_v56 }
 0x430   : > { %v1373_v1 = vpop.xlane.xlu0 %1372 }
 0x431   : > { %3138 = vpow2.f32 %v1430_v57  ;;  %v1413_v3 = vsub.f32 %v3590_v12, %v1373_v1 }
 0x432   : > { %3140 = vpow2.f32 %v1428_v2 }
 0x433   : > { %v1432_v4 = vmul.f32 1.442695, %v1413_v3 }
 0x435   : > { %3142 = vpow2.f32 %v1432_v4 }
 0x43b   : > { %v3652_v60 = vpop.eup %3138 }
 0x43c   : > { %v1464_v62 = vsel %vm964_vm3, %v3652_v60, 0.0  ;;  %v3662_v6 = vpop.eup %3140 }
 0x43d   : > { %v1461_v7 = vsel %vm964_vm3, %v3662_v6, 0.0 }
 0x43f   : > { %v3666_v8 = vpop.eup %3142 }
 0x440   : > { %v1467_v9 = vsel %vm964_vm3, %v3666_v8, 0.0 }
 0x44b   : > { %1459 = vadd.xlane.f32.xlu0 %v1458_v59 }
 0x44d   : > { %1408 = vmax.xlane.f32.xlu1 %v1407_v61 }
 0x44f   : > { %1465 = vadd.xlane.f32.xlu0 %v1464_v62 }
 0x45e   : > { %3056 = vrot.lane.b32.xlu1 %v3516_v25, %s3286_s28 }
 0x482   : > { %1462 = vadd.xlane.f32.xlu1 %v1461_v7 }
 0x486   : > { %1468 = vadd.xlane.f32.xlu1 %v1467_v9 }
 0x48b   : > { %v1376_v5 = vpop.xlane.xlu0 %1375 }
 0x48c   : > { %v1414_v10 = vsub.f32 %v3594_v15, %v1376_v5 }
 0x48d   : > { %v1379_v13 = vpop.xlane.xlu1 %1378 }
 0x48e   : > { %v1434_v12 = vmul.f32 1.442695, %v1414_v10  ;;  %v1415_v14 = vsub.f32 %v3598_v19, %v1379_v13 }
 0x490   : > { %3144 = vpow2.f32 %v1434_v12  ;;  %v1436_v16 = vmul.f32 1.442695, %v1415_v14 }
 0x492   : > { %3146 = vpow2.f32 %v1436_v16 }
 0x493   : > { %v1382_v18 = vpop.xlane.xlu0 %1381 }
 0x494   : > { %v1416_v20 = vsub.f32 %v3602_v22, %v1382_v18 }
 0x495   : > { %v1385_v21 = vpop.xlane.xlu1 %1384 }
 0x496   : > { %v1438_v23 = vmul.f32 1.442695, %v1416_v20  ;;  %v1417_v24 = vsub.f32 %v3606_v26, %v1385_v21 }
 0x497   : > { %v1388_v27 = vpop.xlane.xlu0 %1387 }
 0x498   : > { %3148 = vpow2.f32 %v1438_v23  ;;  %v1440_v28 = vmul.f32 1.442695, %v1417_v24  ;;  %v1418_v30 = vsub.f32 %v3610_v29, %v1388_v27 }
 0x499   : > { %v1391_v15 = vpop.xlane.xlu1 %1390 }
 0x49a   : > { %v3675_v31 = vpop.eup %3144  ;;  %3150 = vpow2.f32 %v1440_v28  ;;  %v1442_v19 = vmul.f32 1.442695, %v1418_v30  ;;  %v1419_v33 = vsub.f32 %v3614_v32, %v1391_v15 }
 0x49b   : > { %v1394_v34 = vpop.xlane.xlu0 %1393  ;;  %v1470_v22 = vsel %vm964_vm3, %v3675_v31, 0.0 }
 0x49c   : > { %v3680_v36 = vpop.eup %3146  ;;  %3152 = vpow2.f32 %v1442_v19  ;;  %v1444_v26 = vmul.f32 1.442695, %v1419_v33  ;;  %v1420_v37 = vsub.f32 %v3618_v35, %v1394_v34  ;;  %1471 = vadd.xlane.f32.xlu0 %v1470_v22 }
 0x49d   : > { %v1397_v39 = vpop.xlane.xlu1 %1396  ;;  %v1473_v29 = vsel %vm964_vm3, %v3680_v36, 0.0 }
 0x49e   : > { %3154 = vpow2.f32 %v1444_v26  ;;  %v1446_v40 = vmul.f32 1.442695, %v1420_v37  ;;  %v1421_v42 = vsub.f32 %v3622_v38, %v1397_v39  ;;  %1474 = vadd.xlane.f32.xlu1 %v1473_v29 }
 0x49f   : > { %v1400_v32 = vpop.xlane.xlu0 %1399 }
 0x4a0   : > { %3156 = vpow2.f32 %v1446_v40  ;;  %v1448_v43 = vmul.f32 1.442695, %v1421_v42  ;;  %v1422_v45 = vsub.f32 %v3626_v41, %v1400_v32 }
 0x4a1   : > { %v1403_v46 = vpop.xlane.xlu1 %1402 }
 0x4a2   : > { %v3687_v48 = vpop.eup %3148  ;;  %3158 = vpow2.f32 %v1448_v43  ;;  %v1450_v35 = vmul.f32 1.442695, %v1422_v45  ;;  %v1423_v49 = vsub.f32 %v3630_v44, %v1403_v46 }
 0x4a3   : > { %v1406_v51 = vpop.xlane.xlu0 %1405  ;;  %v1476_v52 = vsel %vm964_vm3, %v3687_v48, 0.0 }
 0x4a4   : > { %v3692_v53 = vpop.eup %3150  ;;  %3160 = vpow2.f32 %v1450_v35  ;;  %v1452_v38 = vmul.f32 1.442695, %v1423_v49  ;;  %v1424_v54 = vsub.f32 %v3634_v47, %v1406_v51  ;;  %1477 = vadd.xlane.f32.xlu0 %v1476_v52 }
 0x4a5   : > { %v1479_v41 = vsel %vm964_vm3, %v3692_v53, 0.0  ;;  %v3047_v9 = vpop.permute.xlu1 %3046 }
 0x4a6   : > { %v3697_v55 = vpop.eup %3152  ;;  %3162 = vpow2.f32 %v1452_v38  ;;  %v1454_v56 = vmul.f32 1.442695, %v1424_v54  ;;  %1480 = vadd.xlane.f32.xlu1 %v1479_v41  ;;  %v3049_v22 = vunpack.i.h.bf16 %v3047_v9  ;;  %v3048_v26 = vunpack.i.l.bf16 %v3047_v9 }
 0x4a7   : > { %v1482_v44 = vsel %vm964_vm3, %v3697_v55, 0.0  ;;  %v3042_v18 = vpop.permute.xlu0 %3041 }
 0x4a8   : > { %v3701_v57 = vpop.eup %3154  ;;  %3164 = vpow2.f32 %v1454_v56  ;;  %1483 = vadd.xlane.f32.xlu0 %v1482_v44  ;;  %v3044_v28 = vunpack.i.h.bf16 %v3042_v18  ;;  %v3043_v30 = vunpack.i.l.bf16 %v3042_v18 }
 0x4a9   : > { %v1485_v59 = vsel %vm964_vm3, %v3701_v57, 0.0  ;;  %v3727_v5 = vpop.permute.xlu1 %3051 }
 0x4aa   : > { %v3705_v47 = vpop.eup %3156  ;;  %1486 = vadd.xlane.f32.xlu1 %v1485_v59  ;;  %v955_v37 = vpack.c.bf16 %v3044_v28, %v3043_v30  ;;  %v3054_v46 = vunpack.i.h.bf16 %v3727_v5  ;;  %v3053_v35 = vunpack.i.l.bf16 %v3727_v5 }
 0x4ab   : > { %v1488_v61 = vsel %vm964_vm3, %v3705_v47, 0.0 }
 0x4ac   : > { %v3709_v62 = vpop.eup %3158  ;;  %1489 = vadd.xlane.f32.xlu0 %v1488_v61  ;;  %v957_v41 = vpack.c.bf16 %v3054_v46, %v3053_v35 }
 0x4ad   : > { %v1491_v63 = vsel %vm964_vm3, %v3709_v62, 0.0 }
 0x4ae   : > { %v3713_v0 = vpop.eup %3160  ;;  %1492 = vadd.xlane.f32.xlu1 %v1491_v63 }
 0x4af   : > { %v1494_v1 = vsel %vm964_vm3, %v3713_v0, 0.0 }
 0x4b0   : > { %v3717_v2 = vpop.eup %3162  ;;  %1495 = vadd.xlane.f32.xlu0 %v1494_v1 }
 0x4b1   : > { %v1497_v3 = vsel %vm964_vm3, %v3717_v2, 0.0 }
 0x4b2   : > { %v3721_v4 = vpop.eup %3164  ;;  %1498 = vadd.xlane.f32.xlu1 %v1497_v3 }
 0x4b3   : > { %v1500_v7 = vsel %vm964_vm3, %v3721_v4, 0.0 }
 0x4b4   : > { %1501 = vadd.xlane.f32.xlu0 %v1500_v7 }
 0x4ca   : > { %3061 = vrot.lane.b32.xlu0 %v3500_v17, %s3284_s29 }
 0x4d8   : > { %v1460_v20 = vpop.xlane.xlu0 %1459 }
 0x4da   : > { %v1409_v10 = vpop.xlane.xlu1 %1408 }
 0x4db   : > { %v1425_v13 = vsub.f32 %v3638_v50, %v1409_v10 }
 0x4dc   : > { %v1466_v21 = vpop.xlane.xlu0 %1465 }
 0x4dd   : > { %v1456_v12 = vmul.f32 1.442695, %v1425_v13 }
 0x4de   : > { %v3736_v17 = vpop.permute.xlu1 %3056 }
 0x4df   : > { %3166 = vpow2.f32 %v1456_v12  ;;  %v3058_v61 = vunpack.i.l.bf16 %v3736_v17 }
 0x4e0   : > { %3168 = vrcp.f32 %v1460_v20 }
 0x4e9   : > { %v3730_v14 = vpop.eup %3166 }
 0x4ea   : > { %v1503_v16 = vsel %vm964_vm3, %v3730_v14, 0.0  ;;  %v3169_v24 = vpop.eup %3168 }
 0x4eb   : > { %1504 = vadd.xlane.f32.xlu1 %v1503_v16  ;;  %v1522_v15 = vmul.f32 %v3169_v24, %v3648_v58  ;;  %v956_v58 = vpack.c.bf16 %v3049_v22, %v3048_v26 }
 0x4fc   : > { %3066 = vrot.lane.b32.xlu1 %v3516_v25, %s3284_s29 }
 0x50f   : > { %v1463_v23 = vpop.xlane.xlu1 %1462 }
 0x510   : > { %3170 = vrcp.f32 %v1463_v23 }
 0x511   : > { %3172 = vrcp.f32 %v1466_v21 }
 0x513   : > { %v1469_v50 = vpop.xlane.xlu1 %1468 }
 0x514   : > { %3174 = vrcp.f32 %v1469_v50 }
 0x51a   : > { %v3171_v27 = vpop.eup %3170 }
 0x51b   : > { %v1523_v19 = vmul.f32 %v3171_v27, %v3662_v6  ;;  %v3173_v25 = vpop.eup %3172 }
 0x51c   : > { %v1524_v39 = vmul.f32 %v3173_v25, %v3652_v60 }
 0x51d   : > { %v1538_v33 = vpack.c.bf16 %v1523_v19, %v1522_v15 }
 0x51e   : > { %v3175_v34 = vpop.eup %3174 }
 0x51f   : > { %v1525_v29 = vmul.f32 %v3175_v34, %v3666_v8  ;;  %2866 = vmatmul.mubr.msk.bf16.vlgmr.msra.gmra.mrb[16].mxu1 %vm964_vm3, %v1538_v33 }
 0x520   : > { %2876 = vmatpush3.bf16.msra.mxu1 %v955_v37  ;;  %2877 = vmatprep.mubr.msk.bf16.mxu1 %vm3283_vm2, %v3281_v11 }
 0x521   : > { %v1539_v40 = vpack.c.bf16 %v1525_v29, %v1524_v39  ;;  %2887 = vmatprep.subr.bf16.mxu1 %v3281_v11 }
 0x523   : > { %2872 = vmatmul.mubr.msk.bf16.vlgmr.msra.gmra.mrb[24].mxu0 %vm964_vm3, %v1539_v40 }
 0x524   : > { %2882 = vmatpush3.bf16.msra.mxu0 %v956_v58  ;;  %2883 = vmatprep.mubr.msk.bf16.mxu0 %vm3283_vm2, %v3281_v11 }
 0x525   : > { %2893 = vmatprep.subr.bf16.mxu0 %v3281_v11 }
 0x529   : > { %v1472_v60 = vpop.xlane.xlu0 %1471 }
 0x52a   : > { %3176 = vrcp.f32 %v1472_v60 }
 0x52b   : > { %v1475_v6 = vpop.xlane.xlu1 %1474 }
 0x52c   : > { %3178 = vrcp.f32 %v1475_v6 }
 0x531   : > { %v1478_v8 = vpop.xlane.xlu0 %1477 }
 0x532   : > { %3180 = vrcp.f32 %v1478_v8 }
 0x533   : > { %v1481_v42 = vpop.xlane.xlu1 %1480 }
 0x534   : > { %v3177_v32 = vpop.eup %3176  ;;  %3182 = vrcp.f32 %v1481_v42 }
 0x535   : > { %v1484_v43 = vpop.xlane.xlu0 %1483  ;;  %v1526_v49 = vmul.f32 %v3177_v32, %v3675_v31 }
 0x536   : > { %v3179_v45 = vpop.eup %3178  ;;  %3184 = vrcp.f32 %v1484_v43 }
 0x537   : > { %v1527_v51 = vmul.f32 %v3179_v45, %v3680_v36  ;;  %v1487_v52 = vpop.xlane.xlu1 %1486  ;;  %v3059_v36 = vunpack.i.h.bf16 %v3736_v17 }
 0x538   : > { %3186 = vrcp.f32 %v1487_v52 }
 0x539   : > { %v1490_v38 = vpop.xlane.xlu0 %1489  ;;  %v1540_v54 = vpack.c.bf16 %v1527_v51, %v1526_v49  ;;  %v958_v13 = vpack.c.bf16 %v3059_v36, %v3058_v61 }
 0x53a   : > { %3188 = vrcp.f32 %v1490_v38 }
 0x53b   : > { %v1493_v56 = vpop.xlane.xlu1 %1492  ;;  %2878 = vmatmul.mubr.msk.bf16.vlgmr.msra.gmra.mrb[20].mxu1 %vm964_vm3, %v1540_v54 }
 0x53c   : > { %v3181_v44 = vpop.eup %3180  ;;  %3190 = vrcp.f32 %v1493_v56  ;;  %2888 = vmatpush3.bf16.msra.mxu1 %v957_v41  ;;  %2889 = vmatprep.mubr.msk.bf16.mxu1 %vm3283_vm2, %v3281_v11 }
 0x53d   : > { %v1496_v59 = vpop.xlane.xlu0 %1495  ;;  %2899 = vmatprep.subr.bf16.mxu1 %v3281_v11  ;;  %v1528_v63 = vmul.f32 %v3181_v44, %v3687_v48 }
 0x53e   : > { %v3183_v31 = vpop.eup %3182  ;;  %3192 = vrcp.f32 %v1496_v59  ;;  %v3112_v59 = vld [vmem:[%s3416_s19] sm:$0xff]  }
 0x53f   : > { %v1529_v1 = vmul.f32 %v3183_v31, %v3692_v53  ;;  %v1499_v3 = vpop.xlane.xlu1 %1498  ;;  %v3113_v31 = vld [vmem:[%s3416_s19 + $0x8] sm:$0xff]  }
 0x540   : > { %v3185_v7 = vpop.eup %3184  ;;  %3194 = vrcp.f32 %v1499_v3 }
 0x541   : > { %v1502_v9 = vpop.xlane.xlu0 %1501  ;;  %v1541_v5 = vpack.c.bf16 %v1529_v1, %v1528_v63  ;;  %v1530_v12 = vmul.f32 %v3185_v7, %v3697_v55  ;;  %v3114_v7 = vld [vmem:[%s3416_s19 + $0x10] sm:$0xff]  }
 0x542   : > { %v3187_v10 = vpop.eup %3186  ;;  %3196 = vrcp.f32 %v1502_v9 }
 0x543   : > { %v1531_v16 = vmul.f32 %v3187_v10, %v3701_v57  ;;  %2884 = vmatmul.mubr.msk.bf16.vlgmr.msra.gmra.mrb[28].mxu0 %vm964_vm3, %v1541_v5 }
 0x544   : > { %v3189_v18 = vpop.eup %3188  ;;  %2894 = vmatpush3.bf16.msra.mxu0 %v958_v13  ;;  %2895 = vmatprep.mubr.msk.bf16.mxu0 %vm3283_vm2, %v3281_v11  ;;  %v3115_v13 = vld [vmem:[%s3416_s19 + $0x18] sm:$0xff]   ;;  %s3972_s19 = sld [smem:[#allocation12_spill]] (!%p2739_p6) }
 0x545   : > { %v3062_v48 = vpop.permute.xlu0 %3061  ;;  %v1542_v53 = vpack.c.bf16 %v1531_v16, %v1530_v12  ;;  %2905 = vmatprep.subr.bf16.mxu0 %v3281_v11  ;;  %v1532_v23 = vmul.f32 %v3189_v18, %v3705_v47 }
 0x546   : > { %v3191_v20 = vpop.eup %3190  ;;  %v3064_v17 = vunpack.i.h.bf16 %v3062_v48  ;;  %v3063_v21 = vunpack.i.l.bf16 %v3062_v48 }
 0x547   : > { %v1533_v55 = vmul.f32 %v3191_v20, %v3709_v62  ;;  %2890 = vmatmul.mubr.msk.bf16.vlgmr.msra.gmra.mrb[24].mxu1 %vm964_vm3, %v1542_v53 }
 0x548   : > { %v3193_v57 = vpop.eup %3192  ;;  %v959_v50 = vpack.c.bf16 %v3064_v17, %v3063_v21  ;;  %2901 = vmatprep.mubr.msk.bf16.mxu1 %vm3283_vm2, %v3281_v11 }
 0x549   : > { %v1543_v24 = vpack.c.bf16 %v1533_v55, %v1532_v23  ;;  %v1534_v28 = vmul.f32 %v3193_v57, %v3713_v0 }
 0x54a   : > { %v3195_v27 = vpop.eup %3194  ;;  %2900 = vmatpush3.bf16.msra.mxu1 %v959_v50 }
 0x54b   : > { %v1535_v30 = vmul.f32 %v3195_v27, %v3717_v2  ;;  %2896 = vmatmul.mubr.msk.bf16.vlgmr.msra.gmra.mrb[32].mxu0 %vm964_vm3, %v1543_v24  ;;  %2911 = vmatprep.subr.bf16.mxu1 %v3112_v59 }
 0x54c   : > { %2907 = vmatprep.mubr.msk.bf16.mxu0 %vm3283_vm2, %v3281_v11  ;;  %v3197_v34 = vpop.eup %3196 }
 0x54d   : > { %v1544_v47 = vpack.c.bf16 %v1535_v30, %v1534_v28  ;;  %v1536_v2 = vmul.f32 %v3197_v34, %v3721_v4 }
 0x54f   : > { %2902 = vmatmul.mubr.msk.bf16.vlgmr.msra.gmra.mrb[28].mxu1 %vm964_vm3, %v1544_v47 }
 0x550   : > { %2912 = vmatpush3.bf16.msra.mxu1 %v3112_v59 }
 0x551   : > { %2913 = vmatprep.subr.bf16.mxu1 %v3113_v31 }
 0x554   : > { %2914 = vmatpush3.bf16.msra.mxu1 %v3113_v31 }
 0x555   : > { %2915 = vmatprep.subr.bf16.mxu1 %v3114_v7 }
 0x558   : > { %2916 = vmatpush3.bf16.msra.mxu1 %v3114_v7 }
 0x559   : > { %2917 = vmatprep.subr.bf16.mxu1 %v3115_v13 }
 0x55c   : > { %2918 = vmatpush3.bf16.msra.mxu1 %v3115_v13 }
 0x578   : > { %v1505_v62 = vpop.xlane.xlu1 %1504 }
 0x579   : > { %3198 = vrcp.f32 %v1505_v62 }
 0x57c   : > { %v3067_v15 = vpop.permute.xlu1 %3066 }
 0x57d   : > { %v3069_v19 = vunpack.i.h.bf16 %v3067_v15  ;;  %v3068_v25 = vunpack.i.l.bf16 %v3067_v15 }
 0x57f   : > { %v960_v33 = vpack.c.bf16 %v3069_v19, %v3068_v25 }
 0x581   : > { %2906 = vmatpush3.bf16.msra.mxu0 %v960_v33 }
 0x583   : > { %v3199_v0 = vpop.eup %3198 }
 0x584   : > { %v1537_v22 = vmul.f32 %v3199_v0, %v3730_v14 }
 0x586   : > { %v1545_v26 = vpack.c.bf16 %v1537_v22, %v1536_v2 }
 0x588   : > { %2908 = vmatmul.mubr.msk.bf16.vlgmr.msra.gmra.mrb[36].mxu0 %vm964_vm3, %v1545_v26 }
 0x5f2   : > { %v3782_v11 = vpop.f32.mrb[16].mxu1 }
 0x5f3   : > { %v2867_v37 = vpop.f32.mrb[17].mxu1 }
 0x5f4   : > { %v3784_v39 = vpop.f32.mrb[18].mxu1 }
 0x5f5   : > { %v2868_v29 = vpop.f32.mrb[19].mxu1 }
 0x5f6   : > { %v3786_v40 = vpop.f32.mrb[24].mxu0 }
 0x5f7   : > { %v2873_v58 = vpop.f32.mrb[25].mxu0 }
 0x5f8   : > { %v3788_v60 = vpop.f32.mrb[26].mxu0 }
 0x5f9   : > { %v2874_v6 = vpop.f32.mrb[27].mxu0 }
 0x60e   : > { %v1671_v8 = vpop.f32.mrb[20].mxu1 }
 0x60f   : > { %v2879_v42 = vpop.f32.mrb[21].mxu1 }
 0x610   : > { %v1674_v4 = vpop.f32.mrb[22].mxu1 }
 0x611   : > { %v3070_v32 = vpack.i.bf16 %v1674_v4, %v1671_v8  ;;  %v2880_v14 = vpop.f32.mrb[23].mxu1 }
 0x613   : > { %3071 = vrot.lane.b32.xlu0 %v3070_v32, %s3287_s21 }
 0x616   : > { %v1715_v43 = vpop.f32.mrb[28].mxu0 }
 0x617   : > { %v2885_v45 = vpop.f32.mrb[29].mxu0 }
 0x618   : > { %v1718_v46 = vpop.f32.mrb[30].mxu0  ;;  %v3216_v45 = vld [vmem:[#allocation2] sm:$0xff] }
 0x619   : > { %v3075_v35 = vpack.i.bf16 %v1718_v46, %v1715_v43  ;;  %v2886_v49 = vpop.f32.mrb[31].mxu0 }
 0x61a   : > { %v1759_v51 = vpop.f32.mrb[24].mxu1 }
 0x61b   : > { %3076 = vrot.lane.b32.xlu1 %v3075_v35, %s3287_s21  ;;  %v2891_v52 = vpop.f32.mrb[25].mxu1  ;;  %v3217_v35 = vld [vmem:[#allocation2 + $0x10] sm:$0xff] }
 0x61c   : > { %v1762_v38 = vpop.f32.mrb[26].mxu1 }
 0x61d   : > { %v3080_v54 = vpack.i.bf16 %v1762_v38, %v1759_v51  ;;  %v2892_v41 = vpop.f32.mrb[27].mxu1  ;;  %v3218_v51 = vld [vmem:[#allocation2 + $0x8] sm:$0xff] }
 0x61e   : > { %v1803_v56 = vpop.f32.mrb[32].mxu0  ;;  %v3219_v41 = vld [vmem:[#allocation2 + $0x18] sm:$0xff] }
 0x61f   : > { %v2897_v44 = vpop.f32.mrb[33].mxu0  ;;  %3081 = vrot.lane.b32.xlu0 %v3080_v54, %s3288_s30 }
 0x620   : > { %v1806_v36 = vpop.f32.mrb[34].mxu0 }
 0x621   : > { %v3085_v61 = vpack.i.bf16 %v1806_v36, %v1803_v56  ;;  %v2898_v63 = vpop.f32.mrb[35].mxu0 }
 0x622   : > { %v1847_v1 = vpop.f32.mrb[28].mxu1 }
 0x623   : > { %3086 = vrot.lane.b32.xlu1 %v3085_v61, %s3288_s30  ;;  %v2903_v3 = vpop.f32.mrb[29].mxu1  ;;  %s3971_s30 = sld [smem:[#allocation11_spill]] (!%p2739_p6) }
 0x624   : > { %v1850_v9 = vpop.f32.mrb[30].mxu1 }
 0x625   : > { %v3090_v5 = vpack.i.bf16 %v1850_v9, %v1847_v1  ;;  %v2904_v10 = vpop.f32.mrb[31].mxu1 }
 0x627   : > { %3091 = vrot.lane.b32.xlu0 %v3090_v5, %s3289_s17 }
 0x65b   : > { %v1891_v12 = vpop.f32.mrb[36].mxu0 }
 0x65c   : > { %v2909_v16 = vpop.f32.mrb[37].mxu0 }
 0x65d   : > { %v1894_v18 = vpop.f32.mrb[38].mxu0 }
 0x65e   : > { %v3095_v48 = vpack.i.bf16 %v1894_v18, %v1891_v12  ;;  %v2910_v53 = vpop.f32.mrb[39].mxu0 }
 0x660   : > { %3096 = vrot.lane.b32.xlu1 %v3095_v48, %s3289_s17 }
 0x685   : > { %v3072_v20 = vpop.permute.xlu0 %3071 }
 0x686   : > { %v3074_v21 = vunpack.i.h.bf16 %v3072_v20  ;;  %v3073_v23 = vunpack.i.l.bf16 %v3072_v20 }
 0x688   : > { %v1947_v24 = vsel %vm964_vm3, %v3784_v39, %v3074_v21  ;;  %v1946_v27 = vsel %vm964_vm3, %v3782_v11, %v3073_v23 }
 0x68d   : > { %v3077_v33 = vpop.permute.xlu1 %3076 }
 0x68e   : > { %v3079_v0 = vunpack.i.h.bf16 %v3077_v33  ;;  %v3078_v2 = vunpack.i.l.bf16 %v3077_v33 }
 0x690   : > { %v1949_v37 = vsel %vm964_vm3, %v3788_v60, %v3079_v0  ;;  %v1948_v39 = vsel %vm964_vm3, %v3786_v40, %v3078_v2 }
 0x691   : > { %v3082_v17 = vpop.permute.xlu0 %3081 }
 0x692   : > { %v3084_v55 = vunpack.i.h.bf16 %v3082_v17  ;;  %v3083_v57 = vunpack.i.l.bf16 %v3082_v17 }
 0x694   : > { %v1952_v47 = vsel %vm1950_vm4, %v1947_v24, %v3084_v55  ;;  %v1951_v62 = vsel %vm1950_vm4, %v1946_v27, %v3083_v57  ;;  %v3116_v55 = vld [vmem:[%s3429_s11] sm:$0xff]   ;;  %v3117_v57 = vld [vmem:[%s3429_s11 + $0x8] sm:$0xff]   ;;  %v3119_v24 = vld [vmem:[%s3429_s11 + $0x18] sm:$0xff]  }
 0x695   : > { %v3087_v34 = vpop.permute.xlu1 %3086  ;;  %2923 = vmatprep.subr.bf16.mxu0 %v3116_v55 }
 0x696   : > { %v3089_v22 = vunpack.i.h.bf16 %v3087_v34  ;;  %v3088_v26 = vunpack.i.l.bf16 %v3087_v34  ;;  %2924 = vmatpush3.bf16.msra.mxu0 %v3116_v55 }
 0x697   : > { %2925 = vmatprep.subr.bf16.mxu0 %v3117_v57 }
 0x698   : > { %v1954_v6 = vsel %vm1950_vm4, %v1949_v37, %v3089_v22  ;;  %v1953_v8 = vsel %vm1950_vm4, %v1948_v39, %v3088_v26  ;;  %v2721_v26 = vld [vmem:[%s3970_s22] ss:$0 sm:$0xff] }
 0x699   : > { %v3092_v50 = vpop.permute.xlu0 %3091 }
 0x69a   : > { %v3094_v28 = vunpack.i.h.bf16 %v3092_v50  ;;  %v3093_v30 = vunpack.i.l.bf16 %v3092_v50  ;;  %2926 = vmatpush3.bf16.msra.mxu0 %v3117_v57  ;;  %v3118_v50 = vld [vmem:[%s3429_s11 + $0x10] sm:$0xff]  }
 0x69b   : > { %2927 = vmatprep.subr.bf16.mxu0 %v3118_v50 }
 0x69c   : > { %v1957_v15 = vsel %vm1955_vm5, %v1952_v47, %v3094_v28  ;;  %v1956_v19 = vsel %vm1955_vm5, %v1951_v62, %v3093_v30 }
 0x69d   : > { %v1960_v25 = vpack.c.bf16 %v1957_v15, %v1956_v19 }
 0x69e   : > { %2928 = vmatpush3.bf16.msra.mxu0 %v3118_v50 }
 0x69f   : > { %2919 = vmatprep.mubr.msk.bf16.mxu1 %vm682_vm1, %v1960_v25  ;;  %2929 = vmatprep.subr.bf16.mxu0 %v3119_v24 }
 0x6a2   : > { %2930 = vmatpush3.bf16.msra.mxu0 %v3119_v24 }
 0x6d2   : > { %v3097_v11 = vpop.permute.xlu1 %3096 }
 0x6d3   : > { %v3099_v29 = vunpack.i.h.bf16 %v3097_v11  ;;  %v3098_v58 = vunpack.i.l.bf16 %v3097_v11 }
 0x6d5   : > { %v1959_v42 = vsel %vm1955_vm5, %v1954_v6, %v3099_v29  ;;  %v1958_v4 = vsel %vm1955_vm5, %v1953_v8, %v3098_v58  ;;  %v2722_v6 = vld [vmem:[%s645_s27] ss:$0 sm:$0xff] }
 0x6d6   : > { %v1961_v32 = vpack.c.bf16 %v1959_v42, %v1958_v4 }
 0x6d8   : > { %2920 = vmatmul.mubr.msk.bf16.vlgmr.msra.gmra.mrb[32].mxu1 %vm682_vm1, %v1961_v32 }
 0x7ab   : > { %v2921_v14 = vpop.f32.mrb[32].mxu1 }
 0x7ac   : > { %v2034_v43 = vpop.f32.mrb[33].mxu1  ;;  %v3814_v49 = vadd.f32 %v3217_v35, %v2921_v14 }
 0x7ad   : > { %v3812_v60 = vadd.f32 %v3216_v45, %v2034_v43  ;;  %v2922_v46 = vpop.f32.mrb[34].mxu1 }
 0x7ae   : > { %v2037_v40 = vpop.f32.mrb[35].mxu1  ;;  %v3822_v56 = vadd.f32 %v3219_v41, %v2922_v46  ;;  %v2061_v44 = vsel %vm682_vm1, %v3814_v49, 0.0  ;;  %v3121_v41 = vld [vmem:[%s3438_s4 + $0x8] sm:$0xff]  }
 0x7af   : > { %v3816_v52 = vadd.f32 %v3218_v51, %v2037_v40  ;;  %v2055_v38 = vsel %vm682_vm1, %v3812_v60, 0.0 }
 0x7b0   : > { %2056 = vadd.xlane.f32.xlu0 %v2055_v38  ;;  %v2064_v59 = vsel %vm682_vm1, %v3822_v56, 0.0 }
 0x7b1   : > { %v2058_v54 = vsel %vm682_vm1, %v3816_v52, 0.0 }
 0x7b2   : > { %2059 = vadd.xlane.f32.xlu1 %v2058_v54  ;;  %v3120_v54 = vld [vmem:[%s3438_s4] sm:$0xff]  }
 0x7b3   : > { %2935 = vmatprep.subr.bf16.mxu1 %v3120_v54 }
 0x7b4   : > { %2062 = vadd.xlane.f32.xlu0 %v2061_v44  ;;  %2936 = vmatpush3.bf16.msra.mxu1 %v3120_v54  ;;  %v3122_v44 = vld [vmem:[%s3438_s4 + $0x10] sm:$0xff]  }
 0x7b5   : > { %2937 = vmatprep.subr.bf16.mxu1 %v3121_v41 }
 0x7b8   : > { %2065 = vadd.xlane.f32.xlu0 %v2064_v59  ;;  %2938 = vmatpush3.bf16.msra.mxu1 %v3121_v41  ;;  %v3123_v59 = vld [vmem:[%s3438_s4 + $0x18] sm:$0xff]  }
 0x7b9   : > { %2939 = vmatprep.subr.bf16.mxu1 %v3122_v44 }
 0x7bc   : > { %2940 = vmatpush3.bf16.msra.mxu1 %v3122_v44 }
 0x7bd   : > { %2941 = vmatprep.subr.bf16.mxu1 %v3123_v59 }
 0x7c0   : > { %2942 = vmatpush3.bf16.msra.mxu1 %v3123_v59 }
 0x83d   : > { %v2057_v31 = vpop.xlane.xlu0 %2056 }
 0x83e   : > { %v2067_v36 = vmul.f32 0.015625, %v2057_v31  ;;  %v3124_v31 = vld [vmem:[%s3438_s4 + $0x20] sm:$0xff]  }
 0x83f   : > { %v2060_v61 = vpop.xlane.xlu1 %2059  ;;  %2943 = vmatprep.subr.bf16.mxu1 %v3124_v31 }
 0x840   : > { %v2071_v63 = vsub.f32 %v3812_v60, %v2067_v36  ;;  %v2068_v1 = vmul.f32 0.015625, %v2060_v61  ;;  %v3125_v36 = vld [vmem:[%s3438_s4 + $0x28] sm:$0xff]   ;;  %2944 = vmatpush3.bf16.msra.mxu1 %v3124_v31  ;;  %v3126_v61 = vld [vmem:[%s3438_s4 + $0x30] sm:$0xff]  }
 0x841   : > { %v2063_v3 = vpop.xlane.xlu0 %2062  ;;  %2945 = vmatprep.subr.bf16.mxu1 %v3125_v36 }
 0x842   : > { %v2072_v7 = vsub.f32 %v3816_v52, %v2068_v1  ;;  %v2069_v9 = vmul.f32 0.015625, %v2063_v3  ;;  %v2075_v5 = vmul.f32 %v2071_v63, %v2071_v63  ;;  %v2723_v1 = vld [vmem:[%s653_s3] ss:$0 sm:$0xff] }
 0x844   : > { %v2073_v10 = vsub.f32 %v3814_v49, %v2069_v9  ;;  %v2079_v13 = vsel %vm682_vm1, %v2075_v5, 0.0  ;;  %v2076_v12 = vmul.f32 %v2072_v7, %v2072_v7  ;;  %2946 = vmatpush3.bf16.msra.mxu1 %v3125_v36 }
 0x845   : > { %2080 = vadd.xlane.f32.xlu0 %v2079_v13  ;;  %v2066_v16 = vpop.xlane.xlu0 %2065  ;;  %2947 = vmatprep.subr.bf16.mxu1 %v3126_v61 }
 0x846   : > { %v2070_v18 = vmul.f32 0.015625, %v2066_v16  ;;  %v2082_v48 = vsel %vm682_vm1, %v2076_v12, 0.0  ;;  %v2077_v53 = vmul.f32 %v2073_v10, %v2073_v10 }
 0x847   : > { %2083 = vadd.xlane.f32.xlu1 %v2082_v48 }
 0x848   : > { %v2074_v20 = vsub.f32 %v3822_v56, %v2070_v18  ;;  %v2085_v17 = vsel %vm682_vm1, %v2077_v53, 0.0  ;;  %2948 = vmatpush3.bf16.msra.mxu1 %v3126_v61 }
 0x849   : > { %2086 = vadd.xlane.f32.xlu0 %v2085_v17 }
 0x84a   : > { %v2078_v21 = vmul.f32 %v2074_v20, %v2074_v20 }
 0x84c   : > { %v2088_v23 = vsel %vm682_vm1, %v2078_v21, 0.0 }
 0x84d   : > { %2089 = vadd.xlane.f32.xlu1 %v2088_v23 }
 0x8d2   : > { %v2081_v27 = vpop.xlane.xlu0 %2080 }
 0x8d3   : > { %v2091_v28 = vmul.f32 0.015625, %v2081_v27 }
 0x8d4   : > { %v2084_v30 = vpop.xlane.xlu1 %2083 }
 0x8d5   : > { %v2095_v47 = vadd.f32 1e-05, %v2091_v28  ;;  %v2092_v62 = vmul.f32 0.015625, %v2084_v30 }
 0x8d6   : > { %v2087_v15 = vpop.xlane.xlu0 %2086 }
 0x8d7   : > { %3200 = vrsqrt.f32 %v2095_v47  ;;  %v2096_v19 = vadd.f32 1e-05, %v2092_v62  ;;  %v2093_v25 = vmul.f32 0.015625, %v2087_v15 }
 0x8d9   : > { %3202 = vrsqrt.f32 %v2096_v19  ;;  %v2097_v33 = vadd.f32 1e-05, %v2093_v25 }
 0x8da   : > { %v2090_v34 = vpop.xlane.xlu1 %2089 }
 0x8db   : > { %3204 = vrsqrt.f32 %v2097_v33  ;;  %v2094_v0 = vmul.f32 0.015625, %v2090_v34 }
 0x8dd   : > { %v2098_v2 = vadd.f32 1e-05, %v2094_v0 }
 0x8df   : > { %3206 = vrsqrt.f32 %v2098_v2 }
 0x8e1   : > { %v3201_v22 = vpop.eup %3200 }
 0x8e2   : > { %v2103_v11 = vmul.f32 %v3201_v22, %v2071_v63  ;;  %v3127_v63 = vld [vmem:[%s3438_s4 + $0x38] sm:$0xff]  }
 0x8e3   : > { %v3203_v37 = vpop.eup %3202  ;;  %2949 = vmatprep.subr.bf16.mxu1 %v3127_v63 }
 0x8e4   : > { %v2104_v39 = vmul.f32 %v3203_v37, %v2072_v7  ;;  %v2113_v29 = vmul.f32 %v2721_v26, %v2103_v11  ;;  %2950 = vmatpush3.bf16.msra.mxu1 %v3127_v63 }
 0x8e5   : > { %v3205_v58 = vpop.eup %3204 }
 0x8e6   : > { %v2105_v8 = vmul.f32 %v3205_v58, %v2073_v10  ;;  %v2114_v42 = vmul.f32 %v2721_v26, %v2104_v39  ;;  %v2123_v4 = vadd.f32 %v2722_v6, %v2113_v29 }
 0x8e8   : > { %v2124_v32 = vadd.f32 %v2722_v6, %v2114_v42  ;;  %v2115_v43 = vmul.f32 %v2721_v26, %v2105_v8 }
 0x8e9   : > { %v3207_v14 = vpop.eup %3206 }
 0x8ea   : > { %v2106_v45 = vmul.f32 %v3207_v14, %v2074_v20  ;;  %v2127_v46 = vpack.c.bf16 %v2124_v32, %v2123_v4  ;;  %v2125_v35 = vadd.f32 %v2722_v6, %v2115_v43 }
 0x8ec   : > { %v2116_v40 = vmul.f32 %v2721_v26, %v2106_v45  ;;  %2931 = vmatprep.mubr.msk.bf16.mxu0 %vm682_vm1, %v2127_v46  ;;  %v2730_v46 = vld [vmem:[%s661_s26] ss:$0 sm:$0xff] }
 0x8ee   : > { %v2126_v51 = vadd.f32 %v2722_v6, %v2116_v40 }
 0x8f0   : > { %v2128_v38 = vpack.c.bf16 %v2126_v51, %v2125_v35 }
 0x8f2   : > { %2932 = vmatmul.mubr.msk.bf16.vlgmr.msra.gmra.mrb[40].mxu0 %vm682_vm1, %v2128_v38 }
 0x9c5   : > { %v2933_v3 = vpop.f32.mrb[40].mxu0 }
 0x9c6   : > { %v2217_v7 = vadd.f32 %v2933_v3, %v2723_v1  ;;  %v2208_v9 = vpop.f32.mrb[41].mxu0 }
 0x9c7   : > { %v2209_v5 = vadd.f32 %v2723_v1, %v2208_v9  ;;  %v2934_v10 = vpop.f32.mrb[42].mxu0 }
 0x9c8   : > { %v2229_v13 = vmul.f32 0.044715, %v2217_v7  ;;  %v2220_v12 = vadd.f32 %v2934_v10, %v2723_v1  ;;  %v2211_v16 = vpop.f32.mrb[43].mxu0  ;;  %v2225_v37 = vmul.f32 0.5, %v2217_v7  ;;  %v3221_v10 = vld [vmem:[%s3951_s13 + $0x8] sm:$0xff] (!%p2739_p6)  }
 0x9c9   : > { %v2227_v18 = vmul.f32 0.044715, %v2209_v5  ;;  %v2212_v48 = vadd.f32 %v2723_v1, %v2211_v16  ;;  %v2223_v58 = vmul.f32 0.5, %v2209_v5 }
 0x9ca   : > { %v2233_v53 = vmul.f32 %v2229_v13, %v2217_v7  ;;  %v2230_v20 = vmul.f32 0.044715, %v2220_v12  ;;  %v2226_v39 = vmul.f32 0.5, %v2220_v12  ;;  %v3222_v13 = vld [vmem:[%s3951_s13 + $0x10] sm:$0xff] (!%p2739_p6)  }
 0x9cb   : > { %v2231_v17 = vmul.f32 %v2227_v18, %v2209_v5  ;;  %v2228_v21 = vmul.f32 0.044715, %v2212_v48  ;;  %v2224_v6 = vmul.f32 0.5, %v2212_v48 }
 0x9cc   : > { %v2237_v23 = vmul.f32 %v2233_v53, %v2217_v7  ;;  %v2234_v55 = vmul.f32 %v2230_v20, %v2220_v12  ;;  %v2740_v20 = vld [vmem:[%s3971_s30] ss:$0 sm:$0xff] (!%p2739_p6) }
 0x9cd   : > { %v2235_v57 = vmul.f32 %v2231_v17, %v2209_v5  ;;  %v2232_v50 = vmul.f32 %v2228_v21, %v2212_v48  ;;  %v2741_v21 = vld [vmem:[%s3972_s19] ss:$0 sm:$0xff] (!%p2739_p6) }
 0x9ce   : > { %v2241_v24 = vadd.f32 %v2237_v23, %v2217_v7  ;;  %v2238_v27 = vmul.f32 %v2234_v55, %v2220_v12 }
 0x9cf   : > { %v2236_v28 = vmul.f32 %v2232_v50, %v2212_v48  ;;  %v2239_v30 = vadd.f32 %v2235_v57, %v2209_v5  ;;  %v3290_v5 = vmov (!%p2739_p6), 0.0   ;;  %v2742_v50 = vld [vmem:[%s3973_s25] ss:$0 sm:$0xff] (!%p2739_p6) }
 0x9d0   : > { %v2245_v47 = vmul.f32 0.7978846, %v2241_v24  ;;  %v2242_v62 = vadd.f32 %v2238_v27, %v2220_v12  ;;  %2955 = vmatprep.subr.bf16.mxu0 (!%p2739_p6), %v3290_v5  ;;  %2963 = vmatprep.mubr.msk.bf16.mxu0 (!%p2739_p6), %vm3291_vm7, %v3290_v5  ;;  %v3223_v12 = vld [vmem:[%s3951_s13 + $0x18] sm:$0xff] (!%p2739_p6)  }
 0x9d1   : > { %v2240_v15 = vadd.f32 %v2236_v28, %v2212_v48  ;;  %v2243_v19 = vmul.f32 0.7978846, %v2239_v30 }
 0x9d2   : > { %3208 = vtanh.f32 %v2245_v47  ;;  %v2246_v25 = vmul.f32 0.7978846, %v2242_v62 }
 0x9d3   : > { %v2244_v33 = vmul.f32 0.7978846, %v2240_v15  ;;  %3210 = vtanh.f32 %v2243_v19 }
 0x9d4   : > { %3212 = vtanh.f32 %v2246_v25 }
 0x9d5   : > { %3214 = vtanh.f32 %v2244_v33 }
 0x9dc   : > { %v3209_v34 = vpop.eup %3208 }
 0x9dd   : > { %v3211_v0 = vpop.eup %3210  ;;  %v2253_v2 = vadd.f32 1.0, %v3209_v34 }
 0x9de   : > { %v3213_v22 = vpop.eup %3212  ;;  %v2251_v26 = vadd.f32 1.0, %v3211_v0 }
 0x9df   : > { %v3215_v11 = vpop.eup %3214  ;;  %v2254_v29 = vadd.f32 1.0, %v3213_v22  ;;  %v2257_v42 = vmul.f32 %v2253_v2, %v2225_v37 }
 0x9e0   : > { %v2252_v8 = vadd.f32 1.0, %v3215_v11  ;;  %v2255_v32 = vmul.f32 %v2251_v26, %v2223_v58 }
 0x9e1   : > { %v2258_v4 = vmul.f32 %v2254_v29, %v2226_v39 }
 0x9e2   : > { %v2256_v14 = vmul.f32 %v2252_v8, %v2224_v6 }
 0x9e3   : > { %v2260_v43 = vpack.c.bf16 %v2258_v4, %v2257_v42 }
 0x9e4   : > { %v2259_v45 = vpack.c.bf16 %v2256_v14, %v2255_v32 }
 0x9e6   : > { %2951 = vmatprep.mubr.bf16.mxu1 %v2259_v45 }
 0x9e7   : > { %2952 = vmatmul.mubr.bf16.vlgmr.msra.gmra.mrb[36].mxu1 %v2260_v43 }
 0xaba   : > { %v2953_v40 = vpop.f32.mrb[36].mxu1 }
 0xabb   : > { %v2375_v35 = vadd.f32 %v2953_v40, %v2730_v46  ;;  %v2366_v51 = vpop.f32.mrb[37].mxu1 }
 0xabc   : > { %v2367_v38 = vadd.f32 %v2730_v46, %v2366_v51  ;;  %v2954_v54 = vpop.f32.mrb[38].mxu1  ;;  %2392 = sbr.rel (%p2739_p6) target bundleno = 3290 (0xcda), region = 88 }
 0xabd   : > { %v2383_v41 = vadd.f32 %v2375_v35, %v3814_v49  ;;  %v2378_v44 = vadd.f32 %v2954_v54, %v2730_v46  ;;  %v2369_v59 = vpop.f32.mrb[39].mxu1 }
 0xabe   : > { %v2381_v31 = vadd.f32 %v2367_v38, %v3812_v60  ;;  %v2370_v36 = vadd.f32 %v2730_v46, %v2369_v59 }
 0xabf   : > { %2387 = vst.msk [vmem:[#allocation2 + $0x10] sm:$0xff] %vm682_vm1, %v2383_v41  ;;  %v2384_v61 = vadd.f32 %v2378_v44, %v3822_v56 }
 0xac0   : > { %2385 = vst.msk [vmem:[#allocation2] sm:$0xff] %vm682_vm1, %v2381_v31  ;;  %v2382_v63 = vadd.f32 %v2370_v36, %v3816_v52  ;;  %v3220_v52 = vld [vmem:[%s3951_s13] sm:$0xff] (!%p2739_p6)  }
 0xac1   : > { %2388 = vst.msk [vmem:[#allocation2 + $0x18] sm:$0xff] %vm682_vm1, %v2384_v61  ;;  %2956 = vmatpush3.bf16.msra.mxu0 (!%p2739_p6), %v3220_v52 }
 0xac2   : > { %2386 = vst.msk [vmem:[#allocation2 + $0x8] sm:$0xff] %vm682_vm1, %v2382_v63  ;;  %2957 = vmatprep.subr.bf16.mxu0 (!%p2739_p6), %v3290_v5 }
 0xac5   : > { %2958 = vmatpush3.bf16.msra.mxu0 %v3221_v10 }
 0xac6   : > { %2959 = vmatprep.subr.bf16.mxu0 %v3290_v5 }
 0xac7   : > { %v2393_v49 = vld [vmem:[#allocation2] ss:$16 sm:$0x3] }
 0xac8   : > { %v2397_v1 = vsel %vm2396_vm6, %v2393_v49, 0.0 }
 0xac9   : > { %2398 = vadd.xlane.f32.xlu0 %v2397_v1  ;;  %2960 = vmatpush3.bf16.msra.mxu0 %v3222_v13 }
 0xaca   : > { %2961 = vmatprep.subr.bf16.mxu0 %v3290_v5 }
 0xacd   : > { %2962 = vmatpush3.bf16.msra.mxu0 %v3223_v12 }
 0xb56   : > { %v2399_v60 = vpop.xlane.xlu0 %2398 }
 0xb57   : > { %v2400_v3 = vmul.f32 0.015625, %v2399_v60 }
 0xb59   : > { %v2401_v7 = vsub.f32 %v2393_v49, %v2400_v3 }
 0xb5b   : > { %v2402_v9 = vmul.f32 %v2401_v7, %v2401_v7 }
 0xb5d   : > { %v2403_v56 = vsel %vm2396_vm6, %v2402_v9, 0.0 }
 0xb5e   : > { %2404 = vadd.xlane.f32.xlu0 %v2403_v56 }
 0xbeb   : > { %v2405_v16 = vpop.xlane.xlu0 %2404 }
 0xbec   : > { %v2406_v18 = vmul.f32 0.015625, %v2405_v16 }
 0xbee   : > { %v2407_v48 = vadd.f32 1e-05, %v2406_v18 }
 0xbf0   : > { %3224 = vrsqrt.f32 %v2407_v48 }
 0xbfa   : > { %v3225_v53 = vpop.eup %3224 }
 0xbfb   : > { %v2409_v17 = vmul.f32 %v3225_v53, %v2401_v7 }
 0xbfd   : > { %v2416_v23 = vmul.f32 %v2740_v20, %v2409_v17 }
 0xbff   : > { %v2423_v55 = vadd.f32 %v2741_v21, %v2416_v23 }
 0xc01   : > { %v2424_v57 = vpack.c.bf16 %v2423_v55, %v2423_v55 }
 0xc03   : > { %2964 = vmatmul.mubr.msk.bf16.vlgmr.msra.gmra.mrb[0].mxu0 %vm682_vm1, %v2424_v57 }
 0xcd6   : > { %v2501_v24 = vpop.f32.mrb[0].mxu0 }
 0xcd7   : > { %v2502_v27 = vadd.f32 %v2742_v50, %v2501_v24  ;;  %v2965_v28 = vpop.f32.mrb[1].mxu0 }
 0xcd8   : > { %v2504_v30 = vpop.f32.mrb[2].mxu0 }
 0xcd9   : > { %2508 = vst.msk [vmem:[#allocation3] sm:$0x3] %vm2507_vm8, %v2502_v27  ;;  %v2966_v47 = vpop.f32.mrb[3].mxu0 }
 0xcda PF: > { %s3974_s27 = sld [smem:[#allocation7_spill]]  ;;  %s3292_s4 = smov [#allocation3]  }
 0xcdb   : > { %s2518_s23 = sshll.u32 %s3292_s4, 4  ;;  %s2519_s23 = int_to_ptr.vmem [resolvable:$true] %s2518_s23 }
 0xcdc   : > { %s3226_s26 = scalar_lea.vmem %s2519_s23, 32  ;;  %p3233_p11 = scmp.lt.s32.totalorder %s2519_s23, %s2519_s23 }
 0xcdd   : > { %p3227_p8 = scmp.ne.s32.totalorder %s2519_s23, %s3226_s26  ;;  %p3234_p12 = scmp.lt.s32.totalorder %s3226_s26, %s3226_s26 }
 0xcdf   : > { %p3235_p13 = por %p3234_p12, %p3233_p11 }
 0xce0   : > { %s3975_s15 = sadd.s32 4294967295, %s3974_s27  }
 0xce1   : > { %p3903_p7 = scmp.eq.s32.totalorder %s3975_s15, 1 }
 0xce3   : > { %p3228_p9 = pnand %p3227_p8, %p3903_p7 }
 0xce5   : > { %p3229_p10 = pneg %p3228_p9 }
 0xce7   : > { %p3236_p0 = pnand %p3235_p13, %p3229_p10 }
 0xce9   : > { %3239 = shalt.err (!%p3236_p0)
}
 0xcea   : > { %s3977_s12 = sld [smem:[#allocation14_spill]] }
 0xcf0   : > { %s3240_s14 = scalar_lea.hbm %s3977_s12, 32 }
 0xcf1   : > { %p3241_p1 = scmp.ne.s32.totalorder %s3977_s12, %s3240_s14  ;;  %p3246_p4 = scmp.lt.u32.totalorder %s3240_s14, %s3977_s12 }
 0xcf3   : > { %p3242_p2 = pnand %p3241_p1, %p3903_p7 }
 0xcf5   : > { %p3243_p3 = pneg %p3242_p2 }
 0xcf7   : > { %p3248_p5 = pnand %p3246_p4, %p3243_p3 }
 0xcf9   : > { %3251 = shalt.err (!%p3248_p5)
}
 0xcfa   : > { %2968 = dma.vmem_to_hbm [thread:$0]  (%p3903_p7), %s2519_s23, 32, %s3977_s12, [#allocation4]  }
 0xcfb   : > { %3265 = dma.done.wait (%p3903_p7), [#allocation4], 32  }
 0xcfc   : > { %3267 = vsyncadd (%p3903_p7), [#allocation4], 4294967264 }
 0xcfd PF: > { %s3978_s11 = sld [smem:[#allocation7_spill]]  ;;  %s3979_s18 = sld [smem:[#allocation6_spill]] }
 0xcfe   : > { %s3980_s19 = sld [smem:[#allocation8_spill]] }
 0xd03   : > { %s26_s20 = sadd.s32 1, %s3978_s11  }
 0xd04   : > { %p23_p6 = scmp.ge.s32.totalorder %s26_s20, 4  }
 0xd06   :  { %25 = sbr.rel (!%p23_p6) target bundleno = 9 (0x9), region = 146 }
 0xd0d   :  { %2531 = vsyncpa [#allocation4], 1 }
 0xd0e   :  { %2533 = vsyncpa [#allocation4 + $0x1], 1 }

</bundles_post_ra>
